<compile_context>
chip_gen: v7x
topology: tpu7x:2x2x1
jax: 0.10.0
libtpu: 0.0.40
codegen_flags: <defaults>
</compile_context>

<pallas_src>
import functools
import math

import jax
import jax.numpy as jnp
from jax.experimental import pallas as pl
from jax.experimental.pallas import tpu as pltpu

_VMEM_LIMIT = 32 * 1024 * 1024   # safe on v5e/v6e (128 MiB phys) and v7x (64 MiB phys)
_HALO = 128                      # halo rows for the direct 3x3 conv (needs 2*(W+2)+2 <= 128)


def _round_up(x, m):
    return ((x + m - 1) // m) * m


def _cparams(*sem):
    return pltpu.CompilerParams(dimension_semantics=sem, vmem_limit_bytes=_VMEM_LIMIT)


# ----------------------------------------------------------------------------
# Pallas kernels
# ----------------------------------------------------------------------------
def _matmul_kernel(a_ref, b_ref, o_ref, acc_ref):
    """Tiled matmul; bf16 operands straight from VMEM, f32 accumulator, bf16/f32 out."""
    @pl.when(pl.program_id(2) == 0)
    def _():
        acc_ref[...] = jnp.zeros_like(acc_ref)

    acc_ref[...] += jnp.dot(a_ref[...], b_ref[...],
                            preferred_element_type=jnp.float32)

    @pl.when(pl.program_id(2) == pl.num_programs(2) - 1)
    def _():
        o_ref[...] = acc_ref[...].astype(o_ref.dtype)


def _conv3x3_kernel(x1_ref, x2_ref, w_ref, o_ref, buf_ref, acc_ref, *, wp, tm):
    """Direct stride-1 3x3 conv on the flattened zero-padded activation.

    x1_ref: (tm, Cin) bf16 rows of the flattened padded input for this output tile.
    x2_ref: (128, Cin) bf16 halo rows directly after x1 (covers max tap offset 2*wp+2).
    w_ref : (9, Cin, Cout) bf16 per-tap weights.
    out[p] = sum_t x_flat[p + (t//3)*wp + (t%3)] @ W_t   (9 shifted MXU matmuls).
    """
    buf_ref[pl.ds(0, tm), :] = x1_ref[...].astype(jnp.float32)
    buf_ref[pl.ds(tm, _HALO), :] = x2_ref[...].astype(jnp.float32)
    acc_ref[...] = jnp.zeros_like(acc_ref)
    for t in range(9):
        off = (t // 3) * wp + (t % 3)
        a = buf_ref[pl.ds(off, tm), :].astype(jnp.bfloat16)
        acc_ref[...] += jnp.dot(a, w_ref[t], preferred_element_type=jnp.float32)
    o_ref[...] = acc_ref[...].astype(o_ref.dtype)


def _stats_kernel(x_ref, sum_ref, sq_ref, s_acc, q_acc):
    """Single-pass per-channel sum and sum-of-squares (f32 accumulators)."""
    @pl.when(pl.program_id(0) == 0)
    def _():
        s_acc[...] = jnp.zeros_like(s_acc)
        q_acc[...] = jnp.zeros_like(q_acc)

    x = x_ref[...].astype(jnp.float32)
    s_acc[...] += jnp.sum(x, axis=0, keepdims=True)
    q_acc[...] += jnp.sum(x * x, axis=0, keepdims=True)

    @pl.when(pl.program_id(0) == pl.num_programs(0) - 1)
    def _():
        sum_ref[...] = s_acc[...]
        sq_ref[...] = q_acc[...]


def _affine_kernel(x_ref, s_ref, b_ref, o_ref, *, relu):
    """y = x * scale + shift (folded BN), optional fused ReLU, bf16/f32 out."""
    y = x_ref[...].astype(jnp.float32) * s_ref[...] + b_ref[...]
    if relu:
        y = jnp.maximum(y, 0.0)
    o_ref[...] = y.astype(o_ref.dtype)


def _affine_add_kernel(x_ref, r_ref, s_ref, b_ref, o_ref, *, relu):
    """Fused BN3 + residual add + ReLU, bf16 out."""
    y = (x_ref[...].astype(jnp.float32) * s_ref[...] + b_ref[...]
         + r_ref[...].astype(jnp.float32))
    if relu:
        y = jnp.maximum(y, 0.0)
    o_ref[...] = y.astype(o_ref.dtype)


def _avgpool_kernel(x_ref, o_ref):
    o_ref[...] = jnp.mean(x_ref[...].astype(jnp.float32),
                          axis=1, keepdims=True).astype(o_ref.dtype)


# ----------------------------------------------------------------------------
# Tile selection helpers
# ----------------------------------------------------------------------------
def _pick_tm(M):
    """M tile for matmul: prefer big divisors, otherwise pad M (never 8-row tiles
    on large M, never a silent full-array blowup)."""
    for c in (512, 256, 128):
        if M % c == 0:
            return c, M
    if M <= 512:
        tm = max(8, _round_up(M, 8))
        return tm, tm
    return 256, _round_up(M, 256)


def _pick_rows(M, row_bytes):
    """Row tile for mem-bound kernels: largest divisor within ~4 MiB per block,
    small-M full block, or pad M up to an aligned tile (no unbounded fallback)."""
    cap = max(8, (4 << 20) // max(row_bytes, 1))
    for c in (2048, 1024, 512, 256, 128, 64, 32, 16, 8):
        if c <= cap and M % c == 0:
            return c, M
    if M <= cap:
        return M, M                       # small odd M: single full-array block
    tr = max(8, (min(cap, 512) // 8) * 8)
    return tr, _round_up(M, tr)


# ----------------------------------------------------------------------------
# Matmul wrapper
# ----------------------------------------------------------------------------
def matmul(a, b, out_dtype=jnp.bfloat16):
    """a: [M, K] bf16, b: [K, N] bf16 -> [M, N] out_dtype (f32 MXU accumulation)."""
    M, K = a.shape
    K2, N = b.shape
    assert K == K2

    # K tile: single step when it fits comfortably, else split on a divisor.
    if K <= 2304:
        tk = K
    else:
        tk = K
        for c in (2048, 1024, 512, 256, 128):
            if K % c == 0:
                tk = c
                break

    # N tile: lane-dense, never drops columns; cap double-buffered B at ~8 MiB.
    if N <= 1024:
        tn = N
    else:
        tn = N
        for c in (1024, 512, 256, 128):
            if N % c == 0 and 4 * tk * c <= (8 << 20):
                tn = c
                break

    tm, Mp = _pick_tm(M)
    if Mp != M:
        a = jnp.pad(a, ((0, Mp - M), (0, 0)))

    grid = (Mp // tm, N // tn, K // tk)
    out = pl.pallas_call(
        _matmul_kernel,
        out_shape=jax.ShapeDtypeStruct((Mp, N), out_dtype),
        grid_spec=pltpu.PrefetchScalarGridSpec(
            num_scalar_prefetch=0,
            grid=grid,
            in_specs=[pl.BlockSpec((tm, tk), lambda i, j, k: (i, k)),
                      pl.BlockSpec((tk, tn), lambda i, j, k: (k, j))],
            out_specs=pl.BlockSpec((tm, tn), lambda i, j, k: (i, j)),
            scratch_shapes=[pltpu.VMEM((tm, tn), jnp.float32)]),
        compiler_params=_cparams("parallel", "parallel", "arbitrary"),
    )(a, b)
    return out if Mp == M else out[:M]


# ----------------------------------------------------------------------------
# Convolutions
# ----------------------------------------------------------------------------
def conv3x3_direct(x, w_taps):
    """Stride-1 / pad-1 3x3 conv without im2col (tap-shifted MXU matmuls, bf16 I/O)."""
    N, H, W, Cin = x.shape
    Cout = w_taps.shape[-1]
    Hp, Wp = H + 2, W + 2
    if 2 * Wp + 2 > _HALO:    # very wide images: fall back (not hit for ResNet @224)
        return conv_im2col(x, w_taps.reshape(9 * Cin, Cout), 3, 1, 1)

    xp = jnp.pad(x, ((0, 0), (1, 1), (1, 1), (0, 0)))
    M = N * Hp * Wp
    x_flat = xp.reshape(M, Cin)

    TM = 512 if M >= 512 else (256 if M >= 256 else 128)
    Mp = _round_up(M, TM)
    rows = Mp + _HALO
    x_flat = jnp.pad(x_flat, ((0, rows - M), (0, 0)))
    nhalo = TM // _HALO

    out = pl.pallas_call(
        functools.partial(_conv3x3_kernel, wp=Wp, tm=TM),
        out_shape=jax.ShapeDtypeStruct((Mp, Cout), jnp.bfloat16),
        grid_spec=pltpu.PrefetchScalarGridSpec(
            num_scalar_prefetch=0,
            grid=(Mp // TM,),
            in_specs=[
                pl.BlockSpec((TM, Cin), lambda m: (m, 0)),
                pl.BlockSpec((_HALO, Cin), lambda m: (m * nhalo + nhalo, 0)),
                pl.BlockSpec((9, Cin, Cout), lambda m: (0, 0, 0)),
            ],
            out_specs=pl.BlockSpec((TM, Cout), lambda m: (m, 0)),
            scratch_shapes=[pltpu.VMEM((TM + _HALO, Cin), jnp.float32),
                            pltpu.VMEM((TM, Cout), jnp.float32)]),
        compiler_params=_cparams("parallel"),
    )(x_flat, x_flat, w_taps)

    return out[:M].reshape(N, Hp, Wp, Cout)[:, :H, :W, :]


def conv_im2col(x, w2d, k, stride, pad):
    """im2col (bf16 patches) + matmul; only conv1 (7x7/s2) and the stride-2 3x3 convs."""
    # TODO(synk): fold the im2col gather into the matmul via per-tap index maps to avoid
    # materializing the k^2-wide patch tensor in HBM.
    N, H, W, Cin = x.shape
    Cout = w2d.shape[1]
    Hout = (H + 2 * pad - k) // stride + 1
    Wout = (W + 2 * pad - k) // stride + 1
    xp = jnp.pad(x, ((0, 0), (pad, pad), (pad, pad), (0, 0)))
    cols = [xp[:, ki:ki + stride * Hout:stride, kj:kj + stride * Wout:stride, :]
            for ki in range(k) for kj in range(k)]
    patches = jnp.concatenate(cols, axis=-1)           # bf16
    y = matmul(patches.reshape(N * Hout * Wout, k * k * Cin), w2d)
    return y.reshape(N, Hout, Wout, Cout)


def conv(x, c):
    if c['kind'] == '1x1':
        s = c['stride']
        if s != 1:
            x = x[:, ::s, ::s, :]
        N, H, W, Cin = x.shape
        y = matmul(x.reshape(N * H * W, Cin), c['w'])
        return y.reshape(N, H, W, -1)
    if c['kind'] == 'direct3x3':
        return conv3x3_direct(x, c['w'])
    return conv_im2col(x, c['w'], c['k'], c['stride'], c['pad'])


# ----------------------------------------------------------------------------
# BatchNorm (training-mode batch stats, single fused stats pass) + fused epilogues
# ----------------------------------------------------------------------------
def _batch_stats(x2d):
    M, C = x2d.shape
    tr, Mp = _pick_rows(M, C * x2d.dtype.itemsize)
    if Mp != M:
        x2d = jnp.pad(x2d, ((0, Mp - M), (0, 0)))       # zero rows: sums unaffected
    sums, sqs = pl.pallas_call(
        _stats_kernel,
        out_shape=(jax.ShapeDtypeStruct((1, C), jnp.float32),
                   jax.ShapeDtypeStruct((1, C), jnp.float32)),
        grid_spec=pltpu.PrefetchScalarGridSpec(
            num_scalar_prefetch=0, grid=(Mp // tr,),
            in_specs=[pl.BlockSpec((tr, C), lambda i: (i, 0))],
            out_specs=(pl.BlockSpec((1, C), lambda i: (0, 0)),
                       pl.BlockSpec((1, C), lambda i: (0, 0))),
            scratch_shapes=[pltpu.VMEM((1, C), jnp.float32),
                            pltpu.VMEM((1, C), jnp.float32)]),
        compiler_params=_cparams("arbitrary"),
    )(x2d)
    mean = sums / M
    var = jnp.maximum(sqs / M - mean * mean, 0.0)        # biased var (PyTorch forward)
    return mean, var


def _affine(x2d, scale, shift, relu, residual, out_dtype):
    M, C = x2d.shape
    nstream = 3 if residual is not None else 2
    tr, Mp = _pick_rows(M, C * 2 * nstream)
    if Mp != M:
        x2d = jnp.pad(x2d, ((0, Mp - M), (0, 0)))
        if residual is not None:
            residual = jnp.pad(residual, ((0, Mp - M), (0, 0)))
    row_spec = pl.BlockSpec((tr, C), lambda i: (i, 0))
    vec_spec = pl.BlockSpec((1, C), lambda i: (0, 0))
    if residual is None:
        kern = functools.partial(_affine_kernel, relu=relu)
        in_specs = [row_spec, vec_spec, vec_spec]
        args = (x2d, scale, shift)
    else:
        kern = functools.partial(_affine_add_kernel, relu=relu)
        in_specs = [row_spec, row_spec, vec_spec, vec_spec]
        args = (x2d, residual, scale, shift)
    out = pl.pallas_call(
        kern,
        out_shape=jax.ShapeDtypeStruct((Mp, C), out_dtype),
        grid_spec=pltpu.PrefetchScalarGridSpec(
            num_scalar_prefetch=0, grid=(Mp // tr,),
            in_specs=in_specs,
            out_specs=pl.BlockSpec((tr, C), lambda i: (i, 0))),
        compiler_params=_cparams("parallel"),
    )(*args)
    return out if Mp == M else out[:M]


def batchnorm(x, gamma, beta, relu=False, residual=None, out_dtype=jnp.bfloat16):
    """BatchNorm2d / BatchNorm1d (batch statistics); optional fused residual + ReLU."""
    shape = x.shape
    C = shape[-1]
    x2 = x.reshape(-1, C)
    mean, var = _batch_stats(x2)
    inv = jax.lax.rsqrt(var + 1e-5)
    scale = gamma.reshape(1, C).astype(jnp.float32) * inv
    shift = beta.reshape(1, C).astype(jnp.float32) - mean * scale
    res2 = None if residual is None else residual.reshape(-1, C)
    y = _affine(x2, scale, shift, relu, res2, out_dtype)
    return y.reshape(shape)
    # TODO(synk): running-statistics updates (training side effects) are not modeled.


# ----------------------------------------------------------------------------
# Pooling
# ----------------------------------------------------------------------------
def maxpool3x3s2(x):
    """3x3/s2/p1 max pool, separable (3 column-maxes then 3 row-maxes)."""
    N, H, W, C = x.shape
    Hout = (H + 2 - 3) // 2 + 1
    Wout = (W + 2 - 3) // 2 + 1
    neg = -jnp.inf
    xp = jnp.pad(x, ((0, 0), (0, 0), (1, 1), (0, 0)), constant_values=neg)
    cm = jnp.maximum(jnp.maximum(xp[:, :, 0:2 * Wout:2, :],
                                 xp[:, :, 1:1 + 2 * Wout:2, :]),
                     xp[:, :, 2:2 + 2 * Wout:2, :])                  # (N, H, Wout, C)
    cp = jnp.pad(cm, ((0, 0), (1, 1), (0, 0), (0, 0)), constant_values=neg)
    out = jnp.maximum(jnp.maximum(cp[:, 0:2 * Hout:2, :, :],
                                  cp[:, 1:1 + 2 * Hout:2, :, :]),
                      cp[:, 2:2 + 2 * Hout:2, :, :])                 # (N, Hout, Wout, C)
    return out


def global_avgpool(x):
    """AdaptiveAvgPool2d((1,1)) -> [N, C]; many images per block."""
    N, H, W, C = x.shape
    HW = H * W
    x3 = x.reshape(N, HW, C)
    per_img = HW * C * x.dtype.itemsize
    nb = 1
    for c in (N, 64, 32, 16, 8, 4, 2, 1):
        if c <= N and N % c == 0 and c * per_img <= (4 << 20):
            nb = c
            break
    y = pl.pallas_call(
        _avgpool_kernel,
        out_shape=jax.ShapeDtypeStruct((N, 1, C), jnp.bfloat16),
        grid_spec=pltpu.PrefetchScalarGridSpec(
            num_scalar_prefetch=0, grid=(N // nb,),
            in_specs=[pl.BlockSpec((nb, HW, C), lambda i: (i, 0, 0))],
            out_specs=pl.BlockSpec((nb, 1, C), lambda i: (i, 0, 0))),
        compiler_params=_cparams("parallel"),
    )(x3)
    return y.reshape(N, C)


# ----------------------------------------------------------------------------
# Deterministic parameter init (ResNet-50 + projector); weights packed to bf16 once.
# ----------------------------------------------------------------------------
def _conv_w(key, kh, kw, cin, cout):
    fan_out = kh * kw * cout
    return jax.random.normal(key, (kh, kw, cin, cout), jnp.float32) * math.sqrt(2.0 / fan_out)


def _lin_w(key, din, dout):
    lim = 1.0 / math.sqrt(din)
    return jax.random.uniform(key, (din, dout), jnp.float32, -lim, lim)


def _pack_conv(w, stride):
    kh, kw, cin, cout = w.shape
    if kh == 1 and kw == 1:
        return {'kind': '1x1', 'stride': stride,
                'w': w.reshape(cin, cout).astype(jnp.bfloat16)}
    if kh == 3 and stride == 1:
        return {'kind': 'direct3x3',
                'w': w.reshape(9, cin, cout).astype(jnp.bfloat16)}
    return {'kind': 'im2col', 'k': kh, 'stride': stride, 'pad': 3 if kh == 7 else 1,
            'w': w.reshape(kh * kw * cin, cout).astype(jnp.bfloat16)}


def init_params(key, proj_hidden_dim=512, out_dim=512):
    keys = iter(jax.random.split(key, 80))
    p = {'conv1': _pack_conv(_conv_w(next(keys), 7, 7, 3, 64), stride=2),
         'bn1': (jnp.ones(64), jnp.zeros(64))}
    stages = []
    in_ch = 64
    cfg = [(64, 3, 1), (128, 4, 2), (256, 6, 2), (512, 3, 2)]   # resnet50
    for width, n_blocks, stride in cfg:
        out_ch = width * 4
        blocks = []
        for b in range(n_blocks):
            s = stride if b == 0 else 1
            blk = {
                'conv1': _pack_conv(_conv_w(next(keys), 1, 1, in_ch, width), 1),
                'bn1': (jnp.ones(width), jnp.zeros(width)),
                'conv2': _pack_conv(_conv_w(next(keys), 3, 3, width, width), s),
                'bn2': (jnp.ones(width), jnp.zeros(width)),
                'conv3': _pack_conv(_conv_w(next(keys), 1, 1, width, out_ch), 1),
                # zero_init_residual=True -> bn3 gamma = 0
                'bn3': (jnp.zeros(out_ch), jnp.zeros(out_ch)),
            }
            if s != 1 or in_ch != out_ch:
                blk['down_conv'] = _pack_conv(_conv_w(next(keys), 1, 1, in_ch, out_ch), s)
                blk['down_bn'] = (jnp.ones(out_ch), jnp.zeros(out_ch))
            blocks.append(blk)
            in_ch = out_ch
        stages.append(blocks)
    p['stages'] = stages

    enc_dim = 2048   # resnet50 fc.in_features
    p['proj'] = {
        'w1': _lin_w(next(keys), enc_dim, proj_hidden_dim).astype(jnp.bfloat16),
        'bn1': (jnp.ones(proj_hidden_dim), jnp.zeros(proj_hidden_dim)),
        'w2': _lin_w(next(keys), proj_hidden_dim, proj_hidden_dim).astype(jnp.bfloat16),
        'bn2': (jnp.ones(proj_hidden_dim), jnp.zeros(proj_hidden_dim)),
        'w3': _lin_w(next(keys), proj_hidden_dim, out_dim).astype(jnp.bfloat16),
        # final BatchNorm1d(affine=False): identity scale / zero shift
        'bn3': (jnp.ones(out_dim), jnp.zeros(out_dim)),
    }
    return p


# ----------------------------------------------------------------------------
# Forward pass
# ----------------------------------------------------------------------------
def bottleneck(x, blk):
    out = conv(x, blk['conv1'])
    out = batchnorm(out, *blk['bn1'], relu=True)
    out = conv(out, blk['conv2'])
    out = batchnorm(out, *blk['bn2'], relu=True)
    out = conv(out, blk['conv3'])
    if 'down_conv' in blk:
        identity = conv(x, blk['down_conv'])
        identity = batchnorm(identity, *blk['down_bn'], relu=False)
    else:
        identity = x
    # BN3 + residual add + ReLU fused in one Pallas kernel.
    return batchnorm(out, *blk['bn3'], relu=True, residual=identity)


def barlow_twins_forward(params, x_nchw):
    # PyTorch input is NCHW; kernels use NHWC + bf16 activation storage.
    x = jnp.transpose(x_nchw.astype(jnp.float32), (0, 2, 3, 1)).astype(jnp.bfloat16)
    # encoder = conv1, bn1, relu, maxpool, layer1..4, avgpool
    x = conv(x, params['conv1'])
    x = batchnorm(x, *params['bn1'], relu=True)
    x = maxpool3x3s2(x)
    for stage in params['stages']:
        for blk in stage:
            x = bottleneck(x, blk)
    h = global_avgpool(x)                      # == .flatten(start_dim=1)
    # projector: Linear -> BN -> ReLU (x2) -> Linear -> BN(affine=False)
    pp = params['proj']
    z = batchnorm(matmul(h, pp['w1']), *pp['bn1'], relu=True)
    z = batchnorm(matmul(z, pp['w2']), *pp['bn2'], relu=True)
    z = batchnorm(matmul(z, pp['w3']), *pp['bn3'], relu=False, out_dtype=jnp.float32)
    return z


if __name__ == "__main__":
    key = jax.random.PRNGKey(0)
    k_param, k_data = jax.random.split(key)
    params = init_params(k_param)
    # Small input consistent with the module: batch=2, 3 channels, 32x32 image.
    x = jax.random.normal(k_data, (2, 3, 32, 32), jnp.float32)
    z = barlow_twins_forward(params, x)
    z = jax.block_until_ready(z)
    assert z.shape == (2, 512), z.shape
    assert bool(jnp.all(jnp.isfinite(z)))
    print("KERNEL_OK")
</pallas_src>

<mosaic_0001>
module attributes {stable_mosaic.version = 11 : i64} {
  func.func @_matmul_kernel(%arg0: i32, %arg1: i32, %arg2: i32, %arg3: memref<512x147xbf16, #tpu.memory_space<vmem>>, %arg4: memref<147x64xbf16, #tpu.memory_space<vmem>>, %arg5: memref<512x64xbf16, #tpu.memory_space<vmem>>, %arg6: memref<512x64xf32, #tpu.memory_space<vmem>>) attributes {dimension_semantics = [#tpu.dimension_semantics<parallel>, #tpu.dimension_semantics<parallel>, #tpu.dimension_semantics<arbitrary>], iteration_bounds = array<i64: 1, 1, 1>, scalar_prefetch = 0 : i64, scratch_operands = 1 : i64, tpu.core_type = #tpu.core_type<tc>, window_params = [{transform_indices = @transform_0, window_bounds = array<i64: 512, 147>}, {transform_indices = @transform_1, window_bounds = array<i64: 147, 64>}, {transform_indices = @transform_2, window_bounds = array<i64: 512, 64>}]} {
    %c0_i32 = arith.constant 0 : i32
    %0 = arith.cmpi eq, %arg2, %c0_i32 : i32
    %1 = arith.extui %0 : i1 to i32
    %c0_i32_0 = arith.constant 0 : i32
    %2 = arith.cmpi ne, %1, %c0_i32_0 : i32
    scf.if %2 {
      %cst_10 = arith.constant 0.000000e+00 : f32
      %12 = vector.broadcast %cst_10 : f32 to vector<512x64xf32>
      %c0_11 = arith.constant 0 : index
      %c0_12 = arith.constant 0 : index
      %13 = vector.load %arg6[%c0_11, %c0_12] : memref<512x64xf32, #tpu.memory_space<vmem>>, vector<512x64xf32>
      tpu.vector_store %arg6[%c0_11, %c0_12], %12 {strides = array<i32>} : memref<512x64xf32, #tpu.memory_space<vmem>>, vector<512x64xf32>,
    } else {
    }
    %c0 = arith.constant 0 : index
    %c0_1 = arith.constant 0 : index
    %3 = vector.load %arg6[%c0, %c0_1] : memref<512x64xf32, #tpu.memory_space<vmem>>, vector<512x64xf32>
    %c0_2 = arith.constant 0 : index
    %c0_3 = arith.constant 0 : index
    %4 = vector.load %arg3[%c0_2, %c0_3] : memref<512x147xbf16, #tpu.memory_space<vmem>>, vector<512x147xbf16>
    %c0_4 = arith.constant 0 : index
    %c0_5 = arith.constant 0 : index
    %5 = vector.load %arg4[%c0_4, %c0_5] : memref<147x64xbf16, #tpu.memory_space<vmem>>, vector<147x64xbf16>
    %cst = arith.constant dense<0.000000e+00> : vector<512x64xf32>
    %6 = tpu.matmul %4, %5, %cst {dimension_numbers = #tpu.dot_dimension_numbers<[1], [0], [0], [1], [0, 0, 1, 1], [], []>} : vector<512x147xbf16>, vector<147x64xbf16>, vector<512x64xf32> -> vector<512x64xf32>
    %7 = arith.addf %3, %6 : vector<512x64xf32>
    %c0_6 = arith.constant 0 : index
    %c0_7 = arith.constant 0 : index
    %8 = vector.load %arg6[%c0_6, %c0_7] : memref<512x64xf32, #tpu.memory_space<vmem>>, vector<512x64xf32>
    tpu.vector_store %arg6[%c0_6, %c0_7], %7 {strides = array<i32>} : memref<512x64xf32, #tpu.memory_space<vmem>>, vector<512x64xf32>,
    %c0_i32_8 = arith.constant 0 : i32
    %9 = arith.cmpi eq, %arg2, %c0_i32_8 : i32
    %10 = arith.extui %9 : i1 to i32
    %c0_i32_9 = arith.constant 0 : i32
    %11 = arith.cmpi ne, %10, %c0_i32_9 : i32
    scf.if %11 {
      %c0_10 = arith.constant 0 : index
      %c0_11 = arith.constant 0 : index
      %12 = vector.load %arg6[%c0_10, %c0_11] : memref<512x64xf32, #tpu.memory_space<vmem>>, vector<512x64xf32>
      %13 = arith.truncf %12 : vector<512x64xf32> to vector<512x64xbf16>
      %c0_12 = arith.constant 0 : index
      %c0_13 = arith.constant 0 : index
      %14 = vector.load %arg5[%c0_12, %c0_13] : memref<512x64xbf16, #tpu.memory_space<vmem>>, vector<512x64xbf16>
      tpu.vector_store %arg5[%c0_12, %c0_13], %13 {strides = array<i32>} : memref<512x64xbf16, #tpu.memory_space<vmem>>, vector<512x64xbf16>,
    } else {
    }
    return
  }
  func.func @transform_0(%arg0: i32, %arg1: i32, %arg2: i32) -> (i32, i32) {
    %c0_i32 = arith.constant 0 : i32
    return %arg0, %arg2 : i32, i32
  }
  func.func @transform_1(%arg0: i32, %arg1: i32, %arg2: i32) -> (i32, i32) {
    %c0_i32 = arith.constant 0 : i32
    return %arg2, %arg1 : i32, i32
  }
  func.func @transform_2(%arg0: i32, %arg1: i32, %arg2: i32) -> (i32, i32) {
    %c0_i32 = arith.constant 0 : i32
    return %arg0, %arg1 : i32, i32
  }
}

</mosaic_0001>

<bundles_post_ra>
// kernel: tpu_custom_call.1
= control target key start
LH: loop header
LB: loop body
LE: loop exit
PB: predicated region body
PF: predicated region fallthrough
CT: control target
= control target key end

     0   :  { %v1850_v0 = vmov 0   ;;  %vm573_vm0 = vcmask 154624   ;;  %vm670_vm1 = vcmask 1040384   ;;  %vm671_vm2 = vcmask 1041408   ;;  %s2574_s1 = inlined_call_operand.vmem [shape: bf16[147,64], index: 1, kind: input, shape index: {}]   ;;  %s2575_s0 = inlined_call_operand.vmem [shape: bf16[512,147], index: 0, kind: input, shape index: {}]   ;;  %s2576_s2 = inlined_call_operand.vmem [shape: bf16[512,64], index: 2, kind: output, shape index: {}]  }
   0x1   :  { %677 = vmatprep.subr.bf16.mxu0 %v1850_v0  ;;  %1721 = vmatprep.subr.bf16.mxu1 %v1850_v0  ;;  %v1744_v1 = vld [vmem:[%s2574_s1] sm:$0xff]   ;;  %v1745_v2 = vld [vmem:[%s2574_s1 + $0x8] sm:$0xff]   ;;  %v1746_v3 = vld [vmem:[%s2574_s1 + $0x10] sm:$0xff]   ;;  %v1851_v11 = vmov 65535   ;;  %vm16_vm3 = vcmask 523264   ;;  %v1852_v17 = vmov 0.0  }
   0x2   :  { %678 = vmatpush1.bf16.msra.mxu0 %v1744_v1  ;;  %1731 = vmatpush1.bf16.msra.mxu1 %v1744_v1  ;;  %v1747_v4 = vld [vmem:[%s2574_s1 + $0x18] sm:$0xff]   ;;  %v1756_v5 = vld [vmem:[%s2575_s0 + $0x4] ss:$8 sps:$4 sm:$0xff]   ;;  %v1750_v9 = vld [vmem:[%s2574_s1 + $0x30] sm:$0xff]   ;;  %v672_v12 = vsel %vm670_vm1, 4294967295, %v1851_v11  ;;  %17 = vst.msk [vmem:[#allocation2] sm:$0xff] %vm16_vm3, %v1852_v17 }
   0x3   :  { %679 = vmatprep.subr.bf16.mxu0 %v1850_v0  ;;  %1722 = vmatprep.subr.bf16.mxu1 %v1850_v0  ;;  %v1759_v6 = vld [vmem:[%s2575_s0 + $0x104] ss:$8 sps:$4 sm:$0xff]   ;;  %v1751_v10 = vld [vmem:[%s2574_s1 + $0x38] sm:$0xff]   ;;  %v1753_v14 = vld [vmem:[%s2574_s1 + $0x48] ss:$0 sps:$4 sm:$0x33]  }
   0x4   :  { %1561 = vmatprep.mubr.msk.bf16.mxu0 %vm573_vm0, %v1756_v5  ;;  %v1748_v7 = vld [vmem:[%s2574_s1 + $0x20] sm:$0xff]   ;;  %1577 = vmatprep.mubr.msk.bf16.mxu1 %vm573_vm0, %v1759_v6  ;;  %v1749_v8 = vld [vmem:[%s2574_s1 + $0x28] sm:$0xff]   ;;  %v673_v15 = vsel %vm671_vm2, %v672_v12, 0  ;;  %18 = vst.msk [vmem:[#allocation2 + $0x8] sm:$0xff] %vm16_vm3, %v1852_v17  ;;  %19 = vst.msk [vmem:[#allocation2 + $0x10] sm:$0xff] %vm16_vm3, %v1852_v17  ;;  %vm1418_vm4 = vcmask 519168  }
   0x5   :  { %v1752_v13 = vld [vmem:[%s2574_s1 + $0x40] sm:$0xff]   ;;  %v1906_v16 = vand.u32 %v1753_v14, %v673_v15  ;;  %20 = vst.msk [vmem:[#allocation2 + $0x18] sm:$0xff] %vm16_vm3, %v1852_v17  ;;  %21 = vst.msk [vmem:[#allocation2 + $0x20] sm:$0xff] %vm16_vm3, %v1852_v17  ;;  %v1760_v20 = vld [vmem:[%s2575_s0 + $0x14] ss:$8 sps:$4 sm:$0xff]  }
   0x6   :  { %680 = vmatpush1.bf16.msra.mxu0 %v1745_v2  ;;  %1732 = vmatpush1.bf16.msra.mxu1 %v1745_v2  ;;  %22 = vst.msk [vmem:[#allocation2 + $0x28] sm:$0xff] %vm16_vm3, %v1852_v17  ;;  %23 = vst.msk [vmem:[#allocation2 + $0x30] sm:$0xff] %vm16_vm3, %v1852_v17  ;;  %v1754_v18 = vld [vmem:[%s2575_s0] ss:$8 sps:$4 sm:$0xff]   ;;  %v1762_v21 = vld [vmem:[%s2575_s0 + $0x114] ss:$8 sps:$4 sm:$0xff]  }
   0x7   :  { %681 = vmatprep.subr.bf16.mxu0 %v1850_v0  ;;  %1723 = vmatprep.subr.bf16.mxu1 %v1850_v0  ;;  %24 = vst.msk [vmem:[#allocation2 + $0x38] sm:$0xff] %vm16_vm3, %v1852_v17  ;;  %25 = vst.msk [vmem:[#allocation2 + $0x40] sm:$0xff] %vm16_vm3, %v1852_v17  ;;  %v1757_v19 = vld [vmem:[%s2575_s0 + $0x100] ss:$8 sps:$4 sm:$0xff]   ;;  %v1764_v22 = vld [vmem:[%s2575_s0 + $0x10] ss:$8 sps:$4 sm:$0xff]  }
   0x8   :  { %26 = vst.msk [vmem:[#allocation2 + $0x48] sm:$0xff] %vm16_vm3, %v1852_v17  ;;  %27 = vst.msk [vmem:[#allocation2 + $0x50] sm:$0xff] %vm16_vm3, %v1852_v17  ;;  %v1765_v23 = vld [vmem:[%s2575_s0 + $0x110] ss:$8 sps:$4 sm:$0xff]   ;;  %v1766_v24 = vld [vmem:[%s2575_s0 + $0x24] ss:$8 sps:$4 sm:$0xff]  }
   0x9   :  { %28 = vst.msk [vmem:[#allocation2 + $0x58] sm:$0xff] %vm16_vm3, %v1852_v17  ;;  %29 = vst.msk [vmem:[#allocation2 + $0x60] sm:$0xff] %vm16_vm3, %v1852_v17  ;;  %v1768_v25 = vld [vmem:[%s2575_s0 + $0x124] ss:$8 sps:$4 sm:$0xff]   ;;  %v1770_v26 = vld [vmem:[%s2575_s0 + $0x20] ss:$8 sps:$4 sm:$0xff]  }
   0xa   :  { %682 = vmatpush1.bf16.msra.mxu0 %v1746_v3  ;;  %1733 = vmatpush1.bf16.msra.mxu1 %v1746_v3  ;;  %30 = vst.msk [vmem:[#allocation2 + $0x68] sm:$0xff] %vm16_vm3, %v1852_v17  ;;  %31 = vst.msk [vmem:[#allocation2 + $0x70] sm:$0xff] %vm16_vm3, %v1852_v17  ;;  %v1771_v27 = vld [vmem:[%s2575_s0 + $0x120] ss:$8 sps:$4 sm:$0xff]   ;;  %v1772_v28 = vld [vmem:[%s2575_s0 + $0x34] ss:$8 sps:$4 sm:$0xff]  }
   0xb   :  { %683 = vmatprep.subr.bf16.mxu0 %v1850_v0  ;;  %1724 = vmatprep.subr.bf16.mxu1 %v1850_v0  ;;  %32 = vst.msk [vmem:[#allocation2 + $0x78] sm:$0xff] %vm16_vm3, %v1852_v17  ;;  %33 = vst.msk [vmem:[#allocation2 + $0x80] sm:$0xff] %vm16_vm3, %v1852_v17  ;;  %v1774_v29 = vld [vmem:[%s2575_s0 + $0x134] ss:$8 sps:$4 sm:$0xff]   ;;  %v1776_v30 = vld [vmem:[%s2575_s0 + $0x30] ss:$8 sps:$4 sm:$0xff]  }
   0xc   :  { %34 = vst.msk [vmem:[#allocation2 + $0x88] sm:$0xff] %vm16_vm3, %v1852_v17  ;;  %35 = vst.msk [vmem:[#allocation2 + $0x90] sm:$0xff] %vm16_vm3, %v1852_v17  ;;  %v1777_v31 = vld [vmem:[%s2575_s0 + $0x130] ss:$8 sps:$4 sm:$0xff]   ;;  %v1778_v32 = vld [vmem:[%s2575_s0 + $0x44] ss:$8 sps:$4 sm:$0xff]  }
   0xd   :  { %36 = vst.msk [vmem:[#allocation2 + $0x98] sm:$0xff] %vm16_vm3, %v1852_v17  ;;  %37 = vst.msk [vmem:[#allocation2 + $0xa0] sm:$0xff] %vm16_vm3, %v1852_v17  ;;  %v1780_v33 = vld [vmem:[%s2575_s0 + $0x144] ss:$8 sps:$4 sm:$0xff]   ;;  %v1782_v34 = vld [vmem:[%s2575_s0 + $0x40] ss:$8 sps:$4 sm:$0xff]  }
   0xe   :  { %684 = vmatpush1.bf16.msra.mxu0 %v1747_v4  ;;  %1734 = vmatpush1.bf16.msra.mxu1 %v1747_v4  ;;  %38 = vst.msk [vmem:[#allocation2 + $0xa8] sm:$0xff] %vm16_vm3, %v1852_v17  ;;  %39 = vst.msk [vmem:[#allocation2 + $0xb0] sm:$0xff] %vm16_vm3, %v1852_v17  ;;  %v1783_v35 = vld [vmem:[%s2575_s0 + $0x140] ss:$8 sps:$4 sm:$0xff]   ;;  %v1784_v36 = vld [vmem:[%s2575_s0 + $0x54] ss:$8 sps:$4 sm:$0xff]  }
   0xf   :  { %685 = vmatprep.subr.bf16.mxu0 %v1850_v0  ;;  %1725 = vmatprep.subr.bf16.mxu1 %v1850_v0  ;;  %40 = vst.msk [vmem:[#allocation2 + $0xb8] sm:$0xff] %vm16_vm3, %v1852_v17  ;;  %41 = vst.msk [vmem:[#allocation2 + $0xc0] sm:$0xff] %vm16_vm3, %v1852_v17  ;;  %v1786_v37 = vld [vmem:[%s2575_s0 + $0x154] ss:$8 sps:$4 sm:$0xff]   ;;  %v1788_v38 = vld [vmem:[%s2575_s0 + $0x50] ss:$8 sps:$4 sm:$0xff]  }
  0x10   :  { %42 = vst.msk [vmem:[#allocation2 + $0xc8] sm:$0xff] %vm16_vm3, %v1852_v17  ;;  %43 = vst.msk [vmem:[#allocation2 + $0xd0] sm:$0xff] %vm16_vm3, %v1852_v17  ;;  %v1789_v39 = vld [vmem:[%s2575_s0 + $0x150] ss:$8 sps:$4 sm:$0xff]   ;;  %v1790_v40 = vld [vmem:[%s2575_s0 + $0x64] ss:$8 sps:$4 sm:$0xff]  }
  0x11   :  { %44 = vst.msk [vmem:[#allocation2 + $0xd8] sm:$0xff] %vm16_vm3, %v1852_v17  ;;  %45 = vst.msk [vmem:[#allocation2 + $0xe0] sm:$0xff] %vm16_vm3, %v1852_v17  ;;  %v1792_v41 = vld [vmem:[%s2575_s0 + $0x164] ss:$8 sps:$4 sm:$0xff]   ;;  %v1794_v42 = vld [vmem:[%s2575_s0 + $0x60] ss:$8 sps:$4 sm:$0xff]  }
  0x12   :  { %686 = vmatpush1.bf16.msra.mxu0 %v1748_v7  ;;  %1735 = vmatpush1.bf16.msra.mxu1 %v1748_v7  ;;  %46 = vst.msk [vmem:[#allocation2 + $0xe8] sm:$0xff] %vm16_vm3, %v1852_v17  ;;  %47 = vst.msk [vmem:[#allocation2 + $0xf0] sm:$0xff] %vm16_vm3, %v1852_v17  ;;  %v1795_v43 = vld [vmem:[%s2575_s0 + $0x160] ss:$8 sps:$4 sm:$0xff]   ;;  %v1796_v44 = vld [vmem:[%s2575_s0 + $0x74] ss:$8 sps:$4 sm:$0xff]  }
  0x13   :  { %687 = vmatprep.subr.bf16.mxu0 %v1850_v0  ;;  %1726 = vmatprep.subr.bf16.mxu1 %v1850_v0  ;;  %48 = vst.msk [vmem:[#allocation2 + $0xf8] sm:$0xff] %vm16_vm3, %v1852_v17  ;;  %49 = vst.msk [vmem:[#allocation2 + $0x100] sm:$0xff] %vm16_vm3, %v1852_v17  ;;  %v1798_v45 = vld [vmem:[%s2575_s0 + $0x174] ss:$8 sps:$4 sm:$0xff]   ;;  %v1800_v46 = vld [vmem:[%s2575_s0 + $0x70] ss:$8 sps:$4 sm:$0xff]  }
  0x14   :  { %50 = vst.msk [vmem:[#allocation2 + $0x108] sm:$0xff] %vm16_vm3, %v1852_v17  ;;  %51 = vst.msk [vmem:[#allocation2 + $0x110] sm:$0xff] %vm16_vm3, %v1852_v17  ;;  %v1801_v47 = vld [vmem:[%s2575_s0 + $0x170] ss:$8 sps:$4 sm:$0xff]   ;;  %v1802_v48 = vld [vmem:[%s2575_s0 + $0x84] ss:$8 sps:$4 sm:$0xff]  }
  0x15   :  { %52 = vst.msk [vmem:[#allocation2 + $0x118] sm:$0xff] %vm16_vm3, %v1852_v17  ;;  %53 = vst.msk [vmem:[#allocation2 + $0x120] sm:$0xff] %vm16_vm3, %v1852_v17  ;;  %v1804_v49 = vld [vmem:[%s2575_s0 + $0x184] ss:$8 sps:$4 sm:$0xff]   ;;  %v1806_v50 = vld [vmem:[%s2575_s0 + $0x80] ss:$8 sps:$4 sm:$0xff]  }
  0x16   :  { %688 = vmatpush1.bf16.msra.mxu0 %v1749_v8  ;;  %1736 = vmatpush1.bf16.msra.mxu1 %v1749_v8  ;;  %54 = vst.msk [vmem:[#allocation2 + $0x128] sm:$0xff] %vm16_vm3, %v1852_v17  ;;  %55 = vst.msk [vmem:[#allocation2 + $0x130] sm:$0xff] %vm16_vm3, %v1852_v17  ;;  %v1807_v51 = vld [vmem:[%s2575_s0 + $0x180] ss:$8 sps:$4 sm:$0xff]   ;;  %v1808_v52 = vld [vmem:[%s2575_s0 + $0x94] ss:$8 sps:$4 sm:$0xff]  }
  0x17   :  { %689 = vmatprep.subr.bf16.mxu0 %v1850_v0  ;;  %1727 = vmatprep.subr.bf16.mxu1 %v1850_v0  ;;  %56 = vst.msk [vmem:[#allocation2 + $0x138] sm:$0xff] %vm16_vm3, %v1852_v17  ;;  %57 = vst.msk [vmem:[#allocation2 + $0x140] sm:$0xff] %vm16_vm3, %v1852_v17  ;;  %v1810_v53 = vld [vmem:[%s2575_s0 + $0x194] ss:$8 sps:$4 sm:$0xff]   ;;  %v1812_v54 = vld [vmem:[%s2575_s0 + $0x90] ss:$8 sps:$4 sm:$0xff]  }
  0x18   :  { %58 = vst.msk [vmem:[#allocation2 + $0x148] sm:$0xff] %vm16_vm3, %v1852_v17  ;;  %59 = vst.msk [vmem:[#allocation2 + $0x150] sm:$0xff] %vm16_vm3, %v1852_v17  ;;  %v1813_v55 = vld [vmem:[%s2575_s0 + $0x190] ss:$8 sps:$4 sm:$0xff]   ;;  %v1814_v56 = vld [vmem:[%s2575_s0 + $0xa4] ss:$8 sps:$4 sm:$0xff]  }
  0x19   :  { %60 = vst.msk [vmem:[#allocation2 + $0x158] sm:$0xff] %vm16_vm3, %v1852_v17  ;;  %61 = vst.msk [vmem:[#allocation2 + $0x160] sm:$0xff] %vm16_vm3, %v1852_v17  ;;  %v1816_v57 = vld [vmem:[%s2575_s0 + $0x1a4] ss:$8 sps:$4 sm:$0xff]   ;;  %v1818_v58 = vld [vmem:[%s2575_s0 + $0xa0] ss:$8 sps:$4 sm:$0xff]  }
  0x1a   :  { %690 = vmatpush1.bf16.msra.mxu0 %v1750_v9  ;;  %1737 = vmatpush1.bf16.msra.mxu1 %v1750_v9  ;;  %62 = vst.msk [vmem:[#allocation2 + $0x168] sm:$0xff] %vm16_vm3, %v1852_v17  ;;  %63 = vst.msk [vmem:[#allocation2 + $0x170] sm:$0xff] %vm16_vm3, %v1852_v17  ;;  %v1819_v59 = vld [vmem:[%s2575_s0 + $0x1a0] ss:$8 sps:$4 sm:$0xff]   ;;  %v1820_v60 = vld [vmem:[%s2575_s0 + $0xb4] ss:$8 sps:$4 sm:$0xff]  }
  0x1b   :  { %691 = vmatprep.subr.bf16.mxu0 %v1850_v0  ;;  %1728 = vmatprep.subr.bf16.mxu1 %v1850_v0  ;;  %64 = vst.msk [vmem:[#allocation2 + $0x178] sm:$0xff] %vm16_vm3, %v1852_v17  ;;  %65 = vst.msk [vmem:[#allocation2 + $0x180] sm:$0xff] %vm16_vm3, %v1852_v17  ;;  %v1822_v61 = vld [vmem:[%s2575_s0 + $0x1b4] ss:$8 sps:$4 sm:$0xff]   ;;  %v1824_v62 = vld [vmem:[%s2575_s0 + $0xb0] ss:$8 sps:$4 sm:$0xff]  }
  0x1c   :  { %66 = vst.msk [vmem:[#allocation2 + $0x188] sm:$0xff] %vm16_vm3, %v1852_v17  ;;  %67 = vst.msk [vmem:[#allocation2 + $0x190] sm:$0xff] %vm16_vm3, %v1852_v17  ;;  %v1825_v63 = vld [vmem:[%s2575_s0 + $0x1b0] ss:$8 sps:$4 sm:$0xff]   ;;  %v1828_v1 = vld [vmem:[%s2575_s0 + $0x1c4] ss:$8 sps:$4 sm:$0xff]  }
  0x1d   :  { %68 = vst.msk [vmem:[#allocation2 + $0x198] sm:$0xff] %vm16_vm3, %v1852_v17  ;;  %69 = vst.msk [vmem:[#allocation2 + $0x1a0] sm:$0xff] %vm16_vm3, %v1852_v17  ;;  %v1830_v2 = vld [vmem:[%s2575_s0 + $0xc0] ss:$8 sps:$4 sm:$0xff]   ;;  %v1832_v4 = vld [vmem:[%s2575_s0 + $0xd4] ss:$8 sps:$4 sm:$0xff]  }
  0x1e   :  { %692 = vmatpush1.bf16.msra.mxu0 %v1751_v10  ;;  %1738 = vmatpush1.bf16.msra.mxu1 %v1751_v10  ;;  %70 = vst.msk [vmem:[#allocation2 + $0x1a8] sm:$0xff] %vm16_vm3, %v1852_v17  ;;  %71 = vst.msk [vmem:[#allocation2 + $0x1b0] sm:$0xff] %vm16_vm3, %v1852_v17  ;;  %v1831_v3 = vld [vmem:[%s2575_s0 + $0x1c0] ss:$8 sps:$4 sm:$0xff]   ;;  %v1834_v5 = vld [vmem:[%s2575_s0 + $0x1d4] ss:$8 sps:$4 sm:$0xff]  }
  0x1f   :  { %693 = vmatprep.subr.bf16.mxu0 %v1850_v0  ;;  %1729 = vmatprep.subr.bf16.mxu1 %v1850_v0  ;;  %72 = vst.msk [vmem:[#allocation2 + $0x1b8] sm:$0xff] %vm16_vm3, %v1852_v17  ;;  %73 = vst.msk [vmem:[#allocation2 + $0x1c0] sm:$0xff] %vm16_vm3, %v1852_v17  ;;  %v1836_v6 = vld [vmem:[%s2575_s0 + $0xd0] ss:$8 sps:$4 sm:$0xff]   ;;  %v1838_v8 = vld [vmem:[%s2575_s0 + $0xe4] ss:$8 sps:$4 sm:$0xff]  }
  0x20   :  { %74 = vst.msk [vmem:[#allocation2 + $0x1c8] sm:$0xff] %vm16_vm3, %v1852_v17  ;;  %75 = vst.msk [vmem:[#allocation2 + $0x1d0] sm:$0xff] %vm16_vm3, %v1852_v17  ;;  %v1837_v7 = vld [vmem:[%s2575_s0 + $0x1d0] ss:$8 sps:$4 sm:$0xff]   ;;  %v1840_v9 = vld [vmem:[%s2575_s0 + $0x1e4] ss:$8 sps:$4 sm:$0xff]  }
  0x21   :  { %76 = vst.msk [vmem:[#allocation2 + $0x1d8] sm:$0xff] %vm16_vm3, %v1852_v17  ;;  %77 = vst.msk [vmem:[#allocation2 + $0x1e0] sm:$0xff] %vm16_vm3, %v1852_v17  ;;  %v1842_v10 = vld [vmem:[%s2575_s0 + $0xe0] ss:$8 sps:$4 sm:$0xff]   ;;  %v1844_v12 = vld [vmem:[%s2575_s0 + $0xf4] ss:$8 sps:$4 sm:$0xff]  }
  0x22   :  { %694 = vmatpush1.bf16.msra.mxu0 %v1752_v13  ;;  %1739 = vmatpush1.bf16.msra.mxu1 %v1752_v13  ;;  %78 = vst.msk [vmem:[#allocation2 + $0x1e8] sm:$0xff] %vm16_vm3, %v1852_v17  ;;  %79 = vst.msk [vmem:[#allocation2 + $0x1f0] sm:$0xff] %vm16_vm3, %v1852_v17  ;;  %v1843_v11 = vld [vmem:[%s2575_s0 + $0x1e0] ss:$8 sps:$4 sm:$0xff]   ;;  %v1846_v13 = vld [vmem:[%s2575_s0 + $0x1f4] ss:$8 sps:$4 sm:$0xff]  }
  0x23   :  { %695 = vmatprep.subr.bf16.mxu0 %v1850_v0  ;;  %1730 = vmatprep.subr.bf16.mxu1 %v1850_v0  ;;  %80 = vst.msk [vmem:[#allocation2 + $0x1f8] sm:$0xff] %vm16_vm3, %v1852_v17  ;;  %v1826_v0 = vld [vmem:[%s2575_s0 + $0xc4] ss:$8 sps:$4 sm:$0xff]   ;;  %v1848_v14 = vld [vmem:[%s2575_s0 + $0xf0] ss:$8 sps:$4 sm:$0xff]  }
  0x24   :  { %v1849_v15 = vld [vmem:[%s2575_s0 + $0x1f0] ss:$8 sps:$4 sm:$0xff]   ;;  %v113_v17 = vld [vmem:[#allocation2 + $0x100] sm:$0xff] }
  0x26   :  { %696 = vmatpush1.bf16.msra.mxu0 %v1906_v16  ;;  %1740 = vmatpush1.bf16.msra.mxu1 %v1906_v16  ;;  %v81_v16 = vld [vmem:[#allocation2] sm:$0xff] }
  0x29   :  { %710 = vmatmul.mubr.bf16.vlgmr.msra.gmra.mrb[0].mxu0 %v1754_v18  ;;  %838 = vmatmul.mubr.bf16.vlgmr.msra.gmra.mrb[0].mxu1 %v1757_v19 }
  0x2a   :  { %1562 = vmatprep.mubr.msk.bf16.mxu0 %vm573_vm0, %v1760_v20  ;;  %1578 = vmatprep.mubr.msk.bf16.mxu1 %vm573_vm0, %v1762_v21  ;;  %v82_v20 = vld [vmem:[#allocation2 + $0x8] sm:$0xff] }
  0x2b   :  { %v114_v21 = vld [vmem:[#allocation2 + $0x108] sm:$0xff] }
  0x31   :  { %718 = vmatmul.mubr.bf16.gmra.mrb[4].mxu0 %v1764_v22  ;;  %846 = vmatmul.mubr.bf16.gmra.mrb[4].mxu1 %v1765_v23 }
  0x32   :  { %1563 = vmatprep.mubr.msk.bf16.mxu0 %vm573_vm0, %v1766_v24  ;;  %1579 = vmatprep.mubr.msk.bf16.mxu1 %vm573_vm0, %v1768_v25 }
  0x39   :  { %726 = vmatmul.mubr.bf16.gmra.mrb[8].mxu0 %v1770_v26  ;;  %854 = vmatmul.mubr.bf16.gmra.mrb[8].mxu1 %v1771_v27 }
  0x3a   :  { %1564 = vmatprep.mubr.msk.bf16.mxu0 %vm573_vm0, %v1772_v28  ;;  %1580 = vmatprep.mubr.msk.bf16.mxu1 %vm573_vm0, %v1774_v29 }
  0x41   :  { %734 = vmatmul.mubr.bf16.gmra.mrb[12].mxu0 %v1776_v30  ;;  %862 = vmatmul.mubr.bf16.gmra.mrb[12].mxu1 %v1777_v31 }
  0x42   :  { %1565 = vmatprep.mubr.msk.bf16.mxu0 %vm573_vm0, %v1778_v32  ;;  %1581 = vmatprep.mubr.msk.bf16.mxu1 %vm573_vm0, %v1780_v33  ;;  %v83_v32 = vld [vmem:[#allocation2 + $0x10] sm:$0xff] }
  0x43   :  { %v115_v33 = vld [vmem:[#allocation2 + $0x110] sm:$0xff] }
  0x49   :  { %742 = vmatmul.mubr.bf16.gmra.mrb[16].mxu0 %v1782_v34  ;;  %870 = vmatmul.mubr.bf16.gmra.mrb[16].mxu1 %v1783_v35 }
  0x4a   :  { %1566 = vmatprep.mubr.msk.bf16.mxu0 %vm573_vm0, %v1784_v36  ;;  %1582 = vmatprep.mubr.msk.bf16.mxu1 %vm573_vm0, %v1786_v37  ;;  %v84_v36 = vld [vmem:[#allocation2 + $0x18] sm:$0xff] }
  0x4b   :  { %v116_v37 = vld [vmem:[#allocation2 + $0x118] sm:$0xff] }
  0x51   :  { %750 = vmatmul.mubr.bf16.gmra.mrb[20].mxu0 %v1788_v38  ;;  %878 = vmatmul.mubr.bf16.gmra.mrb[20].mxu1 %v1789_v39 }
  0x52   :  { %1567 = vmatprep.mubr.msk.bf16.mxu0 %vm573_vm0, %v1790_v40  ;;  %1583 = vmatprep.mubr.msk.bf16.mxu1 %vm573_vm0, %v1792_v41 }
  0x59   :  { %758 = vmatmul.mubr.bf16.gmra.mrb[24].mxu0 %v1794_v42  ;;  %886 = vmatmul.mubr.bf16.gmra.mrb[24].mxu1 %v1795_v43 }
  0x5a   :  { %1568 = vmatprep.mubr.msk.bf16.mxu0 %vm573_vm0, %v1796_v44  ;;  %1584 = vmatprep.mubr.msk.bf16.mxu1 %vm573_vm0, %v1798_v45 }
  0x61   :  { %766 = vmatmul.mubr.bf16.gmra.mrb[28].mxu0 %v1800_v46  ;;  %894 = vmatmul.mubr.bf16.gmra.mrb[28].mxu1 %v1801_v47 }
  0x62   :  { %1569 = vmatprep.mubr.msk.bf16.mxu0 %vm573_vm0, %v1802_v48  ;;  %1585 = vmatprep.mubr.msk.bf16.mxu1 %vm573_vm0, %v1804_v49 }
  0x69   :  { %774 = vmatmul.mubr.bf16.gmra.mrb[32].mxu0 %v1806_v50  ;;  %902 = vmatmul.mubr.bf16.gmra.mrb[32].mxu1 %v1807_v51 }
  0x6a   :  { %1570 = vmatprep.mubr.msk.bf16.mxu0 %vm573_vm0, %v1808_v52  ;;  %1586 = vmatprep.mubr.msk.bf16.mxu1 %vm573_vm0, %v1810_v53 }
  0x71   :  { %782 = vmatmul.mubr.bf16.gmra.mrb[36].mxu0 %v1812_v54  ;;  %910 = vmatmul.mubr.bf16.gmra.mrb[36].mxu1 %v1813_v55 }
  0x72   :  { %1571 = vmatprep.mubr.msk.bf16.mxu0 %vm573_vm0, %v1814_v56  ;;  %1587 = vmatprep.mubr.msk.bf16.mxu1 %vm573_vm0, %v1816_v57  ;;  %v85_v56 = vld [vmem:[#allocation2 + $0x20] sm:$0xff] }
  0x73   :  { %v117_v57 = vld [vmem:[#allocation2 + $0x120] sm:$0xff] }
  0x79   :  { %790 = vmatmul.mubr.bf16.gmra.mrb[40].mxu0 %v1818_v58  ;;  %918 = vmatmul.mubr.bf16.gmra.mrb[40].mxu1 %v1819_v59 }
  0x7a   :  { %1572 = vmatprep.mubr.msk.bf16.mxu0 %vm573_vm0, %v1820_v60  ;;  %1588 = vmatprep.mubr.msk.bf16.mxu1 %vm573_vm0, %v1822_v61  ;;  %v86_v60 = vld [vmem:[#allocation2 + $0x28] sm:$0xff] }
  0x7b   :  { %v118_v61 = vld [vmem:[#allocation2 + $0x128] sm:$0xff] }
  0x81   :  { %798 = vmatmul.mubr.bf16.gmra.mrb[44].mxu0 %v1824_v62  ;;  %926 = vmatmul.mubr.bf16.gmra.mrb[44].mxu1 %v1825_v63 }
  0x82   :  { %1573 = vmatprep.mubr.msk.bf16.mxu0 %vm573_vm0, %v1826_v0  ;;  %1589 = vmatprep.mubr.msk.bf16.mxu1 %vm573_vm0, %v1828_v1 }
  0x89   :  { %806 = vmatmul.mubr.bf16.gmra.mrb[48].mxu0 %v1830_v2  ;;  %934 = vmatmul.mubr.bf16.gmra.mrb[48].mxu1 %v1831_v3 }
  0x8a   :  { %1574 = vmatprep.mubr.msk.bf16.mxu0 %vm573_vm0, %v1832_v4  ;;  %1590 = vmatprep.mubr.msk.bf16.mxu1 %vm573_vm0, %v1834_v5 }
  0x91   :  { %814 = vmatmul.mubr.bf16.gmra.mrb[52].mxu0 %v1836_v6  ;;  %942 = vmatmul.mubr.bf16.gmra.mrb[52].mxu1 %v1837_v7 }
  0x92   :  { %1575 = vmatprep.mubr.msk.bf16.mxu0 %vm573_vm0, %v1838_v8  ;;  %1591 = vmatprep.mubr.msk.bf16.mxu1 %vm573_vm0, %v1840_v9 }
  0x99   :  { %822 = vmatmul.mubr.bf16.gmra.mrb[56].mxu0 %v1842_v10  ;;  %950 = vmatmul.mubr.bf16.gmra.mrb[56].mxu1 %v1843_v11 }
  0x9a   :  { %1576 = vmatprep.mubr.msk.bf16.mxu0 %vm573_vm0, %v1844_v12  ;;  %1592 = vmatprep.mubr.msk.bf16.mxu1 %vm573_vm0, %v1846_v13 }
  0xa1   :  { %830 = vmatmul.mubr.bf16.gmra.mrb[60].mxu0 %v1848_v14  ;;  %958 = vmatmul.mubr.bf16.gmra.mrb[60].mxu1 %v1849_v15 }
  0xfc   :  { %v711_v18 = vpop.f32.mrb[0].mxu0  ;;  %v839_v19 = vpop.f32.mrb[0].mxu1 }
  0xfd   :  { %v966_v22 = vadd.f32 %v711_v18, %v81_v16  ;;  %v998_v23 = vadd.f32 %v839_v19, %v113_v17  ;;  %v713_v24 = vpop.f32.mrb[1].mxu0  ;;  %v841_v25 = vpop.f32.mrb[1].mxu1  ;;  %v87_v16 = vld [vmem:[#allocation2 + $0x30] sm:$0xff] }
  0xfe   :  { %v714_v26 = vpop.f32.mrb[2].mxu0  ;;  %v842_v27 = vpop.f32.mrb[2].mxu1  ;;  %v119_v17 = vld [vmem:[#allocation2 + $0x130] sm:$0xff] }
  0xff   :  { %1031 = vst.msk [vmem:[#allocation2] sm:$0xff] %vm16_vm3, %v966_v22  ;;  %1063 = vst.msk [vmem:[#allocation2 + $0x100] sm:$0xff] %vm16_vm3, %v998_v23  ;;  %v967_v28 = vadd.f32 %v714_v26, %v82_v20  ;;  %v999_v29 = vadd.f32 %v842_v27, %v114_v21  ;;  %v716_v30 = vpop.f32.mrb[3].mxu0  ;;  %v844_v31 = vpop.f32.mrb[3].mxu1  ;;  %v88_v20 = vld [vmem:[#allocation2 + $0x38] sm:$0xff] }
 0x100   :  { %v120_v21 = vld [vmem:[#allocation2 + $0x138] sm:$0xff] }
 0x101   :  { %1032 = vst.msk [vmem:[#allocation2 + $0x8] sm:$0xff] %vm16_vm3, %v967_v28  ;;  %1064 = vst.msk [vmem:[#allocation2 + $0x108] sm:$0xff] %vm16_vm3, %v999_v29 }
 0x104   :  { %v719_v34 = vpop.f32.mrb[4].mxu0  ;;  %v847_v35 = vpop.f32.mrb[4].mxu1 }
 0x105   :  { %v968_v38 = vadd.f32 %v719_v34, %v83_v32  ;;  %v1000_v39 = vadd.f32 %v847_v35, %v115_v33  ;;  %v721_v40 = vpop.f32.mrb[5].mxu0  ;;  %v849_v41 = vpop.f32.mrb[5].mxu1 }
 0x106   :  { %v1098_v42 = vld [vmem:[#allocation2] sm:$0xff]  ;;  %v722_v44 = vpop.f32.mrb[6].mxu0  ;;  %v850_v45 = vpop.f32.mrb[6].mxu1 }
 0x107   :  { %v1130_v43 = vld [vmem:[#allocation2 + $0x100] sm:$0xff]  ;;  %v1657_v46 = vpack.c.bf16 %v1098_v42, %v1098_v42  ;;  %1033 = vst.msk [vmem:[#allocation2 + $0x10] sm:$0xff] %vm16_vm3, %v968_v38  ;;  %1065 = vst.msk [vmem:[#allocation2 + $0x110] sm:$0xff] %vm16_vm3, %v1000_v39  ;;  %v969_v48 = vadd.f32 %v722_v44, %v84_v36  ;;  %v1001_v49 = vadd.f32 %v850_v45, %v116_v37  ;;  %v724_v50 = vpop.f32.mrb[7].mxu0  ;;  %v852_v51 = vpop.f32.mrb[7].mxu1  ;;  %v90_v44 = vld [vmem:[#allocation2 + $0x48] sm:$0xff] }
 0x108   :  { %v1689_v47 = vpack.c.bf16 %v1130_v43, %v1130_v43  ;;  %v1099_v52 = vld [vmem:[#allocation2 + $0x8] sm:$0xff]  ;;  %v89_v40 = vld [vmem:[#allocation2 + $0x40] sm:$0xff] }
 0x109   :  { %v1131_v53 = vld [vmem:[#allocation2 + $0x108] sm:$0xff]  ;;  %1419 = vst.msk [vmem:[%s2576_s2] sm:$0xf] %vm1418_vm4, %v1657_v46  ;;  %v1658_v54 = vpack.c.bf16 %v1099_v52, %v1099_v52  ;;  %v121_v41 = vld [vmem:[#allocation2 + $0x140] sm:$0xff] }
 0x10a   :  { %1451 = vst.msk [vmem:[%s2576_s2 + $0x80] sm:$0xf] %vm1418_vm4, %v1689_v47  ;;  %v1690_v55 = vpack.c.bf16 %v1131_v53, %v1131_v53  ;;  %v122_v45 = vld [vmem:[#allocation2 + $0x148] sm:$0xff] }
 0x10b   :  { %1034 = vst.msk [vmem:[#allocation2 + $0x18] sm:$0xff] %vm16_vm3, %v969_v48  ;;  %1066 = vst.msk [vmem:[#allocation2 + $0x118] sm:$0xff] %vm16_vm3, %v1001_v49 }
 0x10c   :  { %1420 = vst.msk [vmem:[%s2576_s2 + $0x4] sm:$0xf] %vm1418_vm4, %v1658_v54  ;;  %1452 = vst.msk [vmem:[%s2576_s2 + $0x84] sm:$0xf] %vm1418_vm4, %v1690_v55  ;;  %v727_v58 = vpop.f32.mrb[8].mxu0  ;;  %v855_v59 = vpop.f32.mrb[8].mxu1 }
 0x10d   :  { %v970_v62 = vadd.f32 %v727_v58, %v85_v56  ;;  %v1002_v63 = vadd.f32 %v855_v59, %v117_v57  ;;  %v729_v0 = vpop.f32.mrb[9].mxu0  ;;  %v857_v1 = vpop.f32.mrb[9].mxu1 }
 0x10e   :  { %v1100_v2 = vld [vmem:[#allocation2 + $0x10] sm:$0xff]  ;;  %v730_v4 = vpop.f32.mrb[10].mxu0  ;;  %v858_v5 = vpop.f32.mrb[10].mxu1 }
 0x10f   :  { %v1132_v3 = vld [vmem:[#allocation2 + $0x110] sm:$0xff]  ;;  %v1659_v6 = vpack.c.bf16 %v1100_v2, %v1100_v2  ;;  %1035 = vst.msk [vmem:[#allocation2 + $0x20] sm:$0xff] %vm16_vm3, %v970_v62  ;;  %1067 = vst.msk [vmem:[#allocation2 + $0x120] sm:$0xff] %vm16_vm3, %v1002_v63  ;;  %v971_v8 = vadd.f32 %v730_v4, %v86_v60  ;;  %v1003_v9 = vadd.f32 %v858_v5, %v118_v61  ;;  %v732_v10 = vpop.f32.mrb[11].mxu0  ;;  %v860_v11 = vpop.f32.mrb[11].mxu1  ;;  %v92_v4 = vld [vmem:[#allocation2 + $0x58] sm:$0xff] }
 0x110   :  { %v1691_v7 = vpack.c.bf16 %v1132_v3, %v1132_v3  ;;  %v91_v0 = vld [vmem:[#allocation2 + $0x50] sm:$0xff]  ;;  %v124_v5 = vld [vmem:[#allocation2 + $0x158] sm:$0xff] }
 0x111   :  { %1421 = vst.msk [vmem:[%s2576_s2 + $0x8] sm:$0xf] %vm1418_vm4, %v1659_v6  ;;  %v123_v1 = vld [vmem:[#allocation2 + $0x150] sm:$0xff] }
 0x112   :  { %v1101_v12 = vld [vmem:[#allocation2 + $0x18] sm:$0xff]  ;;  %1453 = vst.msk [vmem:[%s2576_s2 + $0x88] sm:$0xf] %vm1418_vm4, %v1691_v7 }
 0x113   :  { %v1133_v13 = vld [vmem:[#allocation2 + $0x118] sm:$0xff]  ;;  %v1660_v14 = vpack.c.bf16 %v1101_v12, %v1101_v12  ;;  %1036 = vst.msk [vmem:[#allocation2 + $0x28] sm:$0xff] %vm16_vm3, %v971_v8  ;;  %1068 = vst.msk [vmem:[#allocation2 + $0x128] sm:$0xff] %vm16_vm3, %v1003_v9 }
 0x114   :  { %v1692_v15 = vpack.c.bf16 %v1133_v13, %v1133_v13  ;;  %v735_v18 = vpop.f32.mrb[12].mxu0  ;;  %v863_v19 = vpop.f32.mrb[12].mxu1 }
 0x115   :  { %1422 = vst.msk [vmem:[%s2576_s2 + $0xc] sm:$0xf] %vm1418_vm4, %v1660_v14  ;;  %v972_v22 = vadd.f32 %v735_v18, %v87_v16  ;;  %v1004_v23 = vadd.f32 %v863_v19, %v119_v17  ;;  %v737_v24 = vpop.f32.mrb[13].mxu0  ;;  %v865_v25 = vpop.f32.mrb[13].mxu1 }
 0x116   :  { %1454 = vst.msk [vmem:[%s2576_s2 + $0x8c] sm:$0xf] %vm1418_vm4, %v1692_v15  ;;  %v1102_v26 = vld [vmem:[#allocation2 + $0x20] sm:$0xff]  ;;  %v738_v28 = vpop.f32.mrb[14].mxu0  ;;  %v866_v29 = vpop.f32.mrb[14].mxu1 }
 0x117   :  { %v1134_v27 = vld [vmem:[#allocation2 + $0x120] sm:$0xff]  ;;  %v1661_v30 = vpack.c.bf16 %v1102_v26, %v1102_v26  ;;  %1037 = vst.msk [vmem:[#allocation2 + $0x30] sm:$0xff] %vm16_vm3, %v972_v22  ;;  %1069 = vst.msk [vmem:[#allocation2 + $0x130] sm:$0xff] %vm16_vm3, %v1004_v23  ;;  %v973_v32 = vadd.f32 %v738_v28, %v88_v20  ;;  %v1005_v33 = vadd.f32 %v866_v29, %v120_v21  ;;  %v740_v34 = vpop.f32.mrb[15].mxu0  ;;  %v868_v35 = vpop.f32.mrb[15].mxu1  ;;  %v94_v28 = vld [vmem:[#allocation2 + $0x68] sm:$0xff] }
 0x118   :  { %v1693_v31 = vpack.c.bf16 %v1134_v27, %v1134_v27  ;;  %v93_v24 = vld [vmem:[#allocation2 + $0x60] sm:$0xff]  ;;  %v126_v29 = vld [vmem:[#allocation2 + $0x168] sm:$0xff] }
 0x119   :  { %1423 = vst.msk [vmem:[%s2576_s2 + $0x10] sm:$0xf] %vm1418_vm4, %v1661_v30  ;;  %v125_v25 = vld [vmem:[#allocation2 + $0x160] sm:$0xff] }
 0x11a   :  { %v1103_v36 = vld [vmem:[#allocation2 + $0x28] sm:$0xff]  ;;  %1455 = vst.msk [vmem:[%s2576_s2 + $0x90] sm:$0xf] %vm1418_vm4, %v1693_v31 }
 0x11b   :  { %v1135_v37 = vld [vmem:[#allocation2 + $0x128] sm:$0xff]  ;;  %v1662_v38 = vpack.c.bf16 %v1103_v36, %v1103_v36  ;;  %1038 = vst.msk [vmem:[#allocation2 + $0x38] sm:$0xff] %vm16_vm3, %v973_v32  ;;  %1070 = vst.msk [vmem:[#allocation2 + $0x138] sm:$0xff] %vm16_vm3, %v1005_v33 }
 0x11c   :  { %v1694_v39 = vpack.c.bf16 %v1135_v37, %v1135_v37  ;;  %v743_v42 = vpop.f32.mrb[16].mxu0  ;;  %v871_v43 = vpop.f32.mrb[16].mxu1 }
 0x11d   :  { %1424 = vst.msk [vmem:[%s2576_s2 + $0x14] sm:$0xf] %vm1418_vm4, %v1662_v38  ;;  %v974_v46 = vadd.f32 %v743_v42, %v89_v40  ;;  %v1006_v47 = vadd.f32 %v871_v43, %v121_v41  ;;  %v745_v48 = vpop.f32.mrb[17].mxu0  ;;  %v873_v49 = vpop.f32.mrb[17].mxu1 }
 0x11e   :  { %1456 = vst.msk [vmem:[%s2576_s2 + $0x94] sm:$0xf] %vm1418_vm4, %v1694_v39  ;;  %v1104_v50 = vld [vmem:[#allocation2 + $0x30] sm:$0xff]  ;;  %v746_v52 = vpop.f32.mrb[18].mxu0  ;;  %v874_v53 = vpop.f32.mrb[18].mxu1 }
 0x11f   :  { %v1136_v51 = vld [vmem:[#allocation2 + $0x130] sm:$0xff]  ;;  %v1663_v54 = vpack.c.bf16 %v1104_v50, %v1104_v50  ;;  %1039 = vst.msk [vmem:[#allocation2 + $0x40] sm:$0xff] %vm16_vm3, %v974_v46  ;;  %1071 = vst.msk [vmem:[#allocation2 + $0x140] sm:$0xff] %vm16_vm3, %v1006_v47  ;;  %v975_v56 = vadd.f32 %v746_v52, %v90_v44  ;;  %v1007_v57 = vadd.f32 %v874_v53, %v122_v45  ;;  %v748_v58 = vpop.f32.mrb[19].mxu0  ;;  %v876_v59 = vpop.f32.mrb[19].mxu1  ;;  %v96_v52 = vld [vmem:[#allocation2 + $0x78] sm:$0xff] }
 0x120   :  { %v1695_v55 = vpack.c.bf16 %v1136_v51, %v1136_v51  ;;  %v95_v48 = vld [vmem:[#allocation2 + $0x70] sm:$0xff]  ;;  %v128_v53 = vld [vmem:[#allocation2 + $0x178] sm:$0xff] }
 0x121   :  { %1425 = vst.msk [vmem:[%s2576_s2 + $0x18] sm:$0xf] %vm1418_vm4, %v1663_v54  ;;  %v127_v49 = vld [vmem:[#allocation2 + $0x170] sm:$0xff] }
 0x122   :  { %v1105_v60 = vld [vmem:[#allocation2 + $0x38] sm:$0xff]  ;;  %1457 = vst.msk [vmem:[%s2576_s2 + $0x98] sm:$0xf] %vm1418_vm4, %v1695_v55 }
 0x123   :  { %v1137_v61 = vld [vmem:[#allocation2 + $0x138] sm:$0xff]  ;;  %v1664_v62 = vpack.c.bf16 %v1105_v60, %v1105_v60  ;;  %1040 = vst.msk [vmem:[#allocation2 + $0x48] sm:$0xff] %vm16_vm3, %v975_v56  ;;  %1072 = vst.msk [vmem:[#allocation2 + $0x148] sm:$0xff] %vm16_vm3, %v1007_v57 }
 0x124   :  { %v1696_v63 = vpack.c.bf16 %v1137_v61, %v1137_v61  ;;  %v751_v2 = vpop.f32.mrb[20].mxu0  ;;  %v879_v3 = vpop.f32.mrb[20].mxu1 }
 0x125   :  { %1426 = vst.msk [vmem:[%s2576_s2 + $0x1c] sm:$0xf] %vm1418_vm4, %v1664_v62  ;;  %v976_v6 = vadd.f32 %v751_v2, %v91_v0  ;;  %v1008_v7 = vadd.f32 %v879_v3, %v123_v1  ;;  %v753_v8 = vpop.f32.mrb[21].mxu0  ;;  %v881_v9 = vpop.f32.mrb[21].mxu1 }
 0x126   :  { %1458 = vst.msk [vmem:[%s2576_s2 + $0x9c] sm:$0xf] %vm1418_vm4, %v1696_v63  ;;  %v1106_v10 = vld [vmem:[#allocation2 + $0x40] sm:$0xff]  ;;  %v754_v12 = vpop.f32.mrb[22].mxu0  ;;  %v882_v13 = vpop.f32.mrb[22].mxu1 }
 0x127   :  { %v1138_v11 = vld [vmem:[#allocation2 + $0x140] sm:$0xff]  ;;  %v1665_v14 = vpack.c.bf16 %v1106_v10, %v1106_v10  ;;  %1041 = vst.msk [vmem:[#allocation2 + $0x50] sm:$0xff] %vm16_vm3, %v976_v6  ;;  %1073 = vst.msk [vmem:[#allocation2 + $0x150] sm:$0xff] %vm16_vm3, %v1008_v7  ;;  %v977_v16 = vadd.f32 %v754_v12, %v92_v4  ;;  %v1009_v17 = vadd.f32 %v882_v13, %v124_v5  ;;  %v756_v18 = vpop.f32.mrb[23].mxu0  ;;  %v884_v19 = vpop.f32.mrb[23].mxu1  ;;  %v98_v12 = vld [vmem:[#allocation2 + $0x88] sm:$0xff] }
 0x128   :  { %v1697_v15 = vpack.c.bf16 %v1138_v11, %v1138_v11  ;;  %v97_v8 = vld [vmem:[#allocation2 + $0x80] sm:$0xff]  ;;  %v130_v13 = vld [vmem:[#allocation2 + $0x188] sm:$0xff] }
 0x129   :  { %1427 = vst.msk [vmem:[%s2576_s2 + $0x20] sm:$0xf] %vm1418_vm4, %v1665_v14  ;;  %v129_v9 = vld [vmem:[#allocation2 + $0x180] sm:$0xff] }
 0x12a   :  { %v1107_v20 = vld [vmem:[#allocation2 + $0x48] sm:$0xff]  ;;  %1459 = vst.msk [vmem:[%s2576_s2 + $0xa0] sm:$0xf] %vm1418_vm4, %v1697_v15 }
 0x12b   :  { %v1139_v21 = vld [vmem:[#allocation2 + $0x148] sm:$0xff]  ;;  %v1666_v22 = vpack.c.bf16 %v1107_v20, %v1107_v20  ;;  %1042 = vst.msk [vmem:[#allocation2 + $0x58] sm:$0xff] %vm16_vm3, %v977_v16  ;;  %1074 = vst.msk [vmem:[#allocation2 + $0x158] sm:$0xff] %vm16_vm3, %v1009_v17 }
 0x12c   :  { %v1698_v23 = vpack.c.bf16 %v1139_v21, %v1139_v21  ;;  %v759_v26 = vpop.f32.mrb[24].mxu0  ;;  %v887_v27 = vpop.f32.mrb[24].mxu1 }
 0x12d   :  { %1428 = vst.msk [vmem:[%s2576_s2 + $0x24] sm:$0xf] %vm1418_vm4, %v1666_v22  ;;  %v978_v30 = vadd.f32 %v759_v26, %v93_v24  ;;  %v1010_v31 = vadd.f32 %v887_v27, %v125_v25  ;;  %v761_v32 = vpop.f32.mrb[25].mxu0  ;;  %v889_v33 = vpop.f32.mrb[25].mxu1 }
 0x12e   :  { %1460 = vst.msk [vmem:[%s2576_s2 + $0xa4] sm:$0xf] %vm1418_vm4, %v1698_v23  ;;  %v1108_v34 = vld [vmem:[#allocation2 + $0x50] sm:$0xff]  ;;  %v762_v36 = vpop.f32.mrb[26].mxu0  ;;  %v890_v37 = vpop.f32.mrb[26].mxu1 }
 0x12f   :  { %v1140_v35 = vld [vmem:[#allocation2 + $0x150] sm:$0xff]  ;;  %v1667_v38 = vpack.c.bf16 %v1108_v34, %v1108_v34  ;;  %1043 = vst.msk [vmem:[#allocation2 + $0x60] sm:$0xff] %vm16_vm3, %v978_v30  ;;  %1075 = vst.msk [vmem:[#allocation2 + $0x160] sm:$0xff] %vm16_vm3, %v1010_v31  ;;  %v979_v40 = vadd.f32 %v762_v36, %v94_v28  ;;  %v1011_v41 = vadd.f32 %v890_v37, %v126_v29  ;;  %v764_v42 = vpop.f32.mrb[27].mxu0  ;;  %v892_v43 = vpop.f32.mrb[27].mxu1  ;;  %v100_v36 = vld [vmem:[#allocation2 + $0x98] sm:$0xff] }
 0x130   :  { %v1699_v39 = vpack.c.bf16 %v1140_v35, %v1140_v35  ;;  %v99_v32 = vld [vmem:[#allocation2 + $0x90] sm:$0xff]  ;;  %v132_v37 = vld [vmem:[#allocation2 + $0x198] sm:$0xff] }
 0x131   :  { %1429 = vst.msk [vmem:[%s2576_s2 + $0x28] sm:$0xf] %vm1418_vm4, %v1667_v38  ;;  %v131_v33 = vld [vmem:[#allocation2 + $0x190] sm:$0xff] }
 0x132   :  { %v1109_v44 = vld [vmem:[#allocation2 + $0x58] sm:$0xff]  ;;  %1461 = vst.msk [vmem:[%s2576_s2 + $0xa8] sm:$0xf] %vm1418_vm4, %v1699_v39 }
 0x133   :  { %v1141_v45 = vld [vmem:[#allocation2 + $0x158] sm:$0xff]  ;;  %v1668_v46 = vpack.c.bf16 %v1109_v44, %v1109_v44  ;;  %1044 = vst.msk [vmem:[#allocation2 + $0x68] sm:$0xff] %vm16_vm3, %v979_v40  ;;  %1076 = vst.msk [vmem:[#allocation2 + $0x168] sm:$0xff] %vm16_vm3, %v1011_v41 }
 0x134   :  { %v1700_v47 = vpack.c.bf16 %v1141_v45, %v1141_v45  ;;  %v767_v50 = vpop.f32.mrb[28].mxu0  ;;  %v895_v51 = vpop.f32.mrb[28].mxu1 }
 0x135   :  { %1430 = vst.msk [vmem:[%s2576_s2 + $0x2c] sm:$0xf] %vm1418_vm4, %v1668_v46  ;;  %v980_v54 = vadd.f32 %v767_v50, %v95_v48  ;;  %v1012_v55 = vadd.f32 %v895_v51, %v127_v49  ;;  %v769_v56 = vpop.f32.mrb[29].mxu0  ;;  %v897_v57 = vpop.f32.mrb[29].mxu1 }
 0x136   :  { %1462 = vst.msk [vmem:[%s2576_s2 + $0xac] sm:$0xf] %vm1418_vm4, %v1700_v47  ;;  %v1110_v58 = vld [vmem:[#allocation2 + $0x60] sm:$0xff]  ;;  %v770_v60 = vpop.f32.mrb[30].mxu0  ;;  %v898_v61 = vpop.f32.mrb[30].mxu1 }
 0x137   :  { %v1142_v59 = vld [vmem:[#allocation2 + $0x160] sm:$0xff]  ;;  %v1669_v62 = vpack.c.bf16 %v1110_v58, %v1110_v58  ;;  %1045 = vst.msk [vmem:[#allocation2 + $0x70] sm:$0xff] %vm16_vm3, %v980_v54  ;;  %1077 = vst.msk [vmem:[#allocation2 + $0x170] sm:$0xff] %vm16_vm3, %v1012_v55  ;;  %v981_v0 = vadd.f32 %v770_v60, %v96_v52  ;;  %v1013_v1 = vadd.f32 %v898_v61, %v128_v53  ;;  %v772_v2 = vpop.f32.mrb[31].mxu0  ;;  %v900_v3 = vpop.f32.mrb[31].mxu1  ;;  %v102_v60 = vld [vmem:[#allocation2 + $0xa8] sm:$0xff] }
 0x138   :  { %v1701_v63 = vpack.c.bf16 %v1142_v59, %v1142_v59  ;;  %v101_v56 = vld [vmem:[#allocation2 + $0xa0] sm:$0xff]  ;;  %v134_v61 = vld [vmem:[#allocation2 + $0x1a8] sm:$0xff] }
 0x139   :  { %1431 = vst.msk [vmem:[%s2576_s2 + $0x30] sm:$0xf] %vm1418_vm4, %v1669_v62  ;;  %v133_v57 = vld [vmem:[#allocation2 + $0x1a0] sm:$0xff] }
 0x13a   :  { %v1111_v4 = vld [vmem:[#allocation2 + $0x68] sm:$0xff]  ;;  %1463 = vst.msk [vmem:[%s2576_s2 + $0xb0] sm:$0xf] %vm1418_vm4, %v1701_v63 }
 0x13b   :  { %v1143_v5 = vld [vmem:[#allocation2 + $0x168] sm:$0xff]  ;;  %v1670_v6 = vpack.c.bf16 %v1111_v4, %v1111_v4  ;;  %1046 = vst.msk [vmem:[#allocation2 + $0x78] sm:$0xff] %vm16_vm3, %v981_v0  ;;  %1078 = vst.msk [vmem:[#allocation2 + $0x178] sm:$0xff] %vm16_vm3, %v1013_v1 }
 0x13c   :  { %v1702_v7 = vpack.c.bf16 %v1143_v5, %v1143_v5  ;;  %v775_v10 = vpop.f32.mrb[32].mxu0  ;;  %v903_v11 = vpop.f32.mrb[32].mxu1 }
 0x13d   :  { %1432 = vst.msk [vmem:[%s2576_s2 + $0x34] sm:$0xf] %vm1418_vm4, %v1670_v6  ;;  %v982_v14 = vadd.f32 %v775_v10, %v97_v8  ;;  %v1014_v15 = vadd.f32 %v903_v11, %v129_v9  ;;  %v777_v16 = vpop.f32.mrb[33].mxu0  ;;  %v905_v17 = vpop.f32.mrb[33].mxu1 }
 0x13e   :  { %1464 = vst.msk [vmem:[%s2576_s2 + $0xb4] sm:$0xf] %vm1418_vm4, %v1702_v7  ;;  %v1112_v18 = vld [vmem:[#allocation2 + $0x70] sm:$0xff]  ;;  %v778_v20 = vpop.f32.mrb[34].mxu0  ;;  %v906_v21 = vpop.f32.mrb[34].mxu1 }
 0x13f   :  { %v1144_v19 = vld [vmem:[#allocation2 + $0x170] sm:$0xff]  ;;  %v1671_v22 = vpack.c.bf16 %v1112_v18, %v1112_v18  ;;  %1047 = vst.msk [vmem:[#allocation2 + $0x80] sm:$0xff] %vm16_vm3, %v982_v14  ;;  %1079 = vst.msk [vmem:[#allocation2 + $0x180] sm:$0xff] %vm16_vm3, %v1014_v15  ;;  %v983_v24 = vadd.f32 %v778_v20, %v98_v12  ;;  %v1015_v25 = vadd.f32 %v906_v21, %v130_v13  ;;  %v780_v26 = vpop.f32.mrb[35].mxu0  ;;  %v908_v27 = vpop.f32.mrb[35].mxu1  ;;  %v104_v20 = vld [vmem:[#allocation2 + $0xb8] sm:$0xff] }
 0x140   :  { %v1703_v23 = vpack.c.bf16 %v1144_v19, %v1144_v19  ;;  %v103_v16 = vld [vmem:[#allocation2 + $0xb0] sm:$0xff]  ;;  %v136_v21 = vld [vmem:[#allocation2 + $0x1b8] sm:$0xff] }
 0x141   :  { %1433 = vst.msk [vmem:[%s2576_s2 + $0x38] sm:$0xf] %vm1418_vm4, %v1671_v22  ;;  %v135_v17 = vld [vmem:[#allocation2 + $0x1b0] sm:$0xff] }
 0x142   :  { %v1113_v28 = vld [vmem:[#allocation2 + $0x78] sm:$0xff]  ;;  %1465 = vst.msk [vmem:[%s2576_s2 + $0xb8] sm:$0xf] %vm1418_vm4, %v1703_v23 }
 0x143   :  { %v1145_v29 = vld [vmem:[#allocation2 + $0x178] sm:$0xff]  ;;  %v1672_v30 = vpack.c.bf16 %v1113_v28, %v1113_v28  ;;  %1048 = vst.msk [vmem:[#allocation2 + $0x88] sm:$0xff] %vm16_vm3, %v983_v24  ;;  %1080 = vst.msk [vmem:[#allocation2 + $0x188] sm:$0xff] %vm16_vm3, %v1015_v25 }
 0x144   :  { %v1704_v31 = vpack.c.bf16 %v1145_v29, %v1145_v29  ;;  %v783_v34 = vpop.f32.mrb[36].mxu0  ;;  %v911_v35 = vpop.f32.mrb[36].mxu1 }
 0x145   :  { %1434 = vst.msk [vmem:[%s2576_s2 + $0x3c] sm:$0xf] %vm1418_vm4, %v1672_v30  ;;  %v984_v38 = vadd.f32 %v783_v34, %v99_v32  ;;  %v1016_v39 = vadd.f32 %v911_v35, %v131_v33  ;;  %v785_v40 = vpop.f32.mrb[37].mxu0  ;;  %v913_v41 = vpop.f32.mrb[37].mxu1 }
 0x146   :  { %1466 = vst.msk [vmem:[%s2576_s2 + $0xbc] sm:$0xf] %vm1418_vm4, %v1704_v31  ;;  %v1114_v42 = vld [vmem:[#allocation2 + $0x80] sm:$0xff]  ;;  %v786_v44 = vpop.f32.mrb[38].mxu0  ;;  %v914_v45 = vpop.f32.mrb[38].mxu1 }
 0x147   :  { %v1146_v43 = vld [vmem:[#allocation2 + $0x180] sm:$0xff]  ;;  %v1673_v46 = vpack.c.bf16 %v1114_v42, %v1114_v42  ;;  %1049 = vst.msk [vmem:[#allocation2 + $0x90] sm:$0xff] %vm16_vm3, %v984_v38  ;;  %1081 = vst.msk [vmem:[#allocation2 + $0x190] sm:$0xff] %vm16_vm3, %v1016_v39  ;;  %v985_v48 = vadd.f32 %v786_v44, %v100_v36  ;;  %v1017_v49 = vadd.f32 %v914_v45, %v132_v37  ;;  %v788_v50 = vpop.f32.mrb[39].mxu0  ;;  %v916_v51 = vpop.f32.mrb[39].mxu1  ;;  %v106_v44 = vld [vmem:[#allocation2 + $0xc8] sm:$0xff] }
 0x148   :  { %v1705_v47 = vpack.c.bf16 %v1146_v43, %v1146_v43  ;;  %v105_v40 = vld [vmem:[#allocation2 + $0xc0] sm:$0xff]  ;;  %v138_v45 = vld [vmem:[#allocation2 + $0x1c8] sm:$0xff] }
 0x149   :  { %1435 = vst.msk [vmem:[%s2576_s2 + $0x40] sm:$0xf] %vm1418_vm4, %v1673_v46  ;;  %v137_v41 = vld [vmem:[#allocation2 + $0x1c0] sm:$0xff] }
 0x14a   :  { %v1115_v52 = vld [vmem:[#allocation2 + $0x88] sm:$0xff]  ;;  %1467 = vst.msk [vmem:[%s2576_s2 + $0xc0] sm:$0xf] %vm1418_vm4, %v1705_v47 }
 0x14b   :  { %v1147_v53 = vld [vmem:[#allocation2 + $0x188] sm:$0xff]  ;;  %v1674_v54 = vpack.c.bf16 %v1115_v52, %v1115_v52  ;;  %1050 = vst.msk [vmem:[#allocation2 + $0x98] sm:$0xff] %vm16_vm3, %v985_v48  ;;  %1082 = vst.msk [vmem:[#allocation2 + $0x198] sm:$0xff] %vm16_vm3, %v1017_v49 }
 0x14c   :  { %v1706_v55 = vpack.c.bf16 %v1147_v53, %v1147_v53  ;;  %v791_v58 = vpop.f32.mrb[40].mxu0  ;;  %v919_v59 = vpop.f32.mrb[40].mxu1 }
 0x14d   :  { %1436 = vst.msk [vmem:[%s2576_s2 + $0x44] sm:$0xf] %vm1418_vm4, %v1674_v54  ;;  %v986_v62 = vadd.f32 %v791_v58, %v101_v56  ;;  %v1018_v63 = vadd.f32 %v919_v59, %v133_v57  ;;  %v793_v0 = vpop.f32.mrb[41].mxu0  ;;  %v921_v1 = vpop.f32.mrb[41].mxu1 }
 0x14e   :  { %1468 = vst.msk [vmem:[%s2576_s2 + $0xc4] sm:$0xf] %vm1418_vm4, %v1706_v55  ;;  %v1116_v2 = vld [vmem:[#allocation2 + $0x90] sm:$0xff]  ;;  %v794_v4 = vpop.f32.mrb[42].mxu0  ;;  %v922_v5 = vpop.f32.mrb[42].mxu1 }
 0x14f   :  { %v1148_v3 = vld [vmem:[#allocation2 + $0x190] sm:$0xff]  ;;  %v1675_v6 = vpack.c.bf16 %v1116_v2, %v1116_v2  ;;  %1051 = vst.msk [vmem:[#allocation2 + $0xa0] sm:$0xff] %vm16_vm3, %v986_v62  ;;  %1083 = vst.msk [vmem:[#allocation2 + $0x1a0] sm:$0xff] %vm16_vm3, %v1018_v63  ;;  %v987_v8 = vadd.f32 %v794_v4, %v102_v60  ;;  %v1019_v9 = vadd.f32 %v922_v5, %v134_v61  ;;  %v796_v10 = vpop.f32.mrb[43].mxu0  ;;  %v924_v11 = vpop.f32.mrb[43].mxu1  ;;  %v108_v4 = vld [vmem:[#allocation2 + $0xd8] sm:$0xff] }
 0x150   :  { %v1707_v7 = vpack.c.bf16 %v1148_v3, %v1148_v3  ;;  %v107_v0 = vld [vmem:[#allocation2 + $0xd0] sm:$0xff]  ;;  %v140_v5 = vld [vmem:[#allocation2 + $0x1d8] sm:$0xff] }
 0x151   :  { %1437 = vst.msk [vmem:[%s2576_s2 + $0x48] sm:$0xf] %vm1418_vm4, %v1675_v6  ;;  %v139_v1 = vld [vmem:[#allocation2 + $0x1d0] sm:$0xff] }
 0x152   :  { %v1117_v12 = vld [vmem:[#allocation2 + $0x98] sm:$0xff]  ;;  %1469 = vst.msk [vmem:[%s2576_s2 + $0xc8] sm:$0xf] %vm1418_vm4, %v1707_v7 }
 0x153   :  { %v1149_v13 = vld [vmem:[#allocation2 + $0x198] sm:$0xff]  ;;  %v1676_v14 = vpack.c.bf16 %v1117_v12, %v1117_v12  ;;  %1052 = vst.msk [vmem:[#allocation2 + $0xa8] sm:$0xff] %vm16_vm3, %v987_v8  ;;  %1084 = vst.msk [vmem:[#allocation2 + $0x1a8] sm:$0xff] %vm16_vm3, %v1019_v9 }
 0x154   :  { %v1708_v15 = vpack.c.bf16 %v1149_v13, %v1149_v13  ;;  %v799_v18 = vpop.f32.mrb[44].mxu0  ;;  %v927_v19 = vpop.f32.mrb[44].mxu1 }
 0x155   :  { %1438 = vst.msk [vmem:[%s2576_s2 + $0x4c] sm:$0xf] %vm1418_vm4, %v1676_v14  ;;  %v988_v22 = vadd.f32 %v799_v18, %v103_v16  ;;  %v1020_v23 = vadd.f32 %v927_v19, %v135_v17  ;;  %v801_v24 = vpop.f32.mrb[45].mxu0  ;;  %v929_v25 = vpop.f32.mrb[45].mxu1 }
 0x156   :  { %1470 = vst.msk [vmem:[%s2576_s2 + $0xcc] sm:$0xf] %vm1418_vm4, %v1708_v15  ;;  %v1118_v26 = vld [vmem:[#allocation2 + $0xa0] sm:$0xff]  ;;  %v802_v28 = vpop.f32.mrb[46].mxu0  ;;  %v930_v29 = vpop.f32.mrb[46].mxu1 }
 0x157   :  { %v1150_v27 = vld [vmem:[#allocation2 + $0x1a0] sm:$0xff]  ;;  %v1677_v30 = vpack.c.bf16 %v1118_v26, %v1118_v26  ;;  %1053 = vst.msk [vmem:[#allocation2 + $0xb0] sm:$0xff] %vm16_vm3, %v988_v22  ;;  %1085 = vst.msk [vmem:[#allocation2 + $0x1b0] sm:$0xff] %vm16_vm3, %v1020_v23  ;;  %v989_v32 = vadd.f32 %v802_v28, %v104_v20  ;;  %v1021_v33 = vadd.f32 %v930_v29, %v136_v21  ;;  %v804_v34 = vpop.f32.mrb[47].mxu0  ;;  %v932_v35 = vpop.f32.mrb[47].mxu1  ;;  %v110_v28 = vld [vmem:[#allocation2 + $0xe8] sm:$0xff] }
 0x158   :  { %v1709_v31 = vpack.c.bf16 %v1150_v27, %v1150_v27  ;;  %v109_v24 = vld [vmem:[#allocation2 + $0xe0] sm:$0xff]  ;;  %v142_v29 = vld [vmem:[#allocation2 + $0x1e8] sm:$0xff] }
 0x159   :  { %1439 = vst.msk [vmem:[%s2576_s2 + $0x50] sm:$0xf] %vm1418_vm4, %v1677_v30  ;;  %v141_v25 = vld [vmem:[#allocation2 + $0x1e0] sm:$0xff] }
 0x15a   :  { %v1119_v36 = vld [vmem:[#allocation2 + $0xa8] sm:$0xff]  ;;  %1471 = vst.msk [vmem:[%s2576_s2 + $0xd0] sm:$0xf] %vm1418_vm4, %v1709_v31 }
 0x15b   :  { %v1151_v37 = vld [vmem:[#allocation2 + $0x1a8] sm:$0xff]  ;;  %v1678_v38 = vpack.c.bf16 %v1119_v36, %v1119_v36  ;;  %1054 = vst.msk [vmem:[#allocation2 + $0xb8] sm:$0xff] %vm16_vm3, %v989_v32  ;;  %1086 = vst.msk [vmem:[#allocation2 + $0x1b8] sm:$0xff] %vm16_vm3, %v1021_v33 }
 0x15c   :  { %v1710_v39 = vpack.c.bf16 %v1151_v37, %v1151_v37  ;;  %v807_v42 = vpop.f32.mrb[48].mxu0  ;;  %v935_v43 = vpop.f32.mrb[48].mxu1 }
 0x15d   :  { %1440 = vst.msk [vmem:[%s2576_s2 + $0x54] sm:$0xf] %vm1418_vm4, %v1678_v38  ;;  %v990_v46 = vadd.f32 %v807_v42, %v105_v40  ;;  %v1022_v47 = vadd.f32 %v935_v43, %v137_v41  ;;  %v809_v48 = vpop.f32.mrb[49].mxu0  ;;  %v937_v49 = vpop.f32.mrb[49].mxu1 }
 0x15e   :  { %1472 = vst.msk [vmem:[%s2576_s2 + $0xd4] sm:$0xf] %vm1418_vm4, %v1710_v39  ;;  %v1120_v50 = vld [vmem:[#allocation2 + $0xb0] sm:$0xff]  ;;  %v810_v52 = vpop.f32.mrb[50].mxu0  ;;  %v938_v53 = vpop.f32.mrb[50].mxu1 }
 0x15f   :  { %v1152_v51 = vld [vmem:[#allocation2 + $0x1b0] sm:$0xff]  ;;  %v1679_v54 = vpack.c.bf16 %v1120_v50, %v1120_v50  ;;  %1055 = vst.msk [vmem:[#allocation2 + $0xc0] sm:$0xff] %vm16_vm3, %v990_v46  ;;  %1087 = vst.msk [vmem:[#allocation2 + $0x1c0] sm:$0xff] %vm16_vm3, %v1022_v47  ;;  %v991_v56 = vadd.f32 %v810_v52, %v106_v44  ;;  %v1023_v57 = vadd.f32 %v938_v53, %v138_v45  ;;  %v812_v58 = vpop.f32.mrb[51].mxu0  ;;  %v940_v59 = vpop.f32.mrb[51].mxu1  ;;  %v112_v52 = vld [vmem:[#allocation2 + $0xf8] sm:$0xff] }
 0x160   :  { %v1711_v55 = vpack.c.bf16 %v1152_v51, %v1152_v51  ;;  %v111_v48 = vld [vmem:[#allocation2 + $0xf0] sm:$0xff]  ;;  %v144_v53 = vld [vmem:[#allocation2 + $0x1f8] sm:$0xff] }
 0x161   :  { %1441 = vst.msk [vmem:[%s2576_s2 + $0x58] sm:$0xf] %vm1418_vm4, %v1679_v54  ;;  %v143_v49 = vld [vmem:[#allocation2 + $0x1f0] sm:$0xff] }
 0x162   :  { %v1121_v60 = vld [vmem:[#allocation2 + $0xb8] sm:$0xff]  ;;  %1473 = vst.msk [vmem:[%s2576_s2 + $0xd8] sm:$0xf] %vm1418_vm4, %v1711_v55 }
 0x163   :  { %v1153_v61 = vld [vmem:[#allocation2 + $0x1b8] sm:$0xff]  ;;  %v1680_v62 = vpack.c.bf16 %v1121_v60, %v1121_v60  ;;  %1056 = vst.msk [vmem:[#allocation2 + $0xc8] sm:$0xff] %vm16_vm3, %v991_v56  ;;  %1088 = vst.msk [vmem:[#allocation2 + $0x1c8] sm:$0xff] %vm16_vm3, %v1023_v57 }
 0x164   :  { %v1712_v63 = vpack.c.bf16 %v1153_v61, %v1153_v61  ;;  %v815_v2 = vpop.f32.mrb[52].mxu0  ;;  %v943_v3 = vpop.f32.mrb[52].mxu1 }
 0x165   :  { %1442 = vst.msk [vmem:[%s2576_s2 + $0x5c] sm:$0xf] %vm1418_vm4, %v1680_v62  ;;  %v992_v6 = vadd.f32 %v815_v2, %v107_v0  ;;  %v1024_v7 = vadd.f32 %v943_v3, %v139_v1  ;;  %v817_v8 = vpop.f32.mrb[53].mxu0  ;;  %v945_v9 = vpop.f32.mrb[53].mxu1 }
 0x166   :  { %1474 = vst.msk [vmem:[%s2576_s2 + $0xdc] sm:$0xf] %vm1418_vm4, %v1712_v63  ;;  %v1122_v10 = vld [vmem:[#allocation2 + $0xc0] sm:$0xff]  ;;  %v818_v12 = vpop.f32.mrb[54].mxu0  ;;  %v946_v13 = vpop.f32.mrb[54].mxu1 }
 0x167   :  { %v1154_v11 = vld [vmem:[#allocation2 + $0x1c0] sm:$0xff]  ;;  %v1681_v14 = vpack.c.bf16 %v1122_v10, %v1122_v10  ;;  %1057 = vst.msk [vmem:[#allocation2 + $0xd0] sm:$0xff] %vm16_vm3, %v992_v6  ;;  %1089 = vst.msk [vmem:[#allocation2 + $0x1d0] sm:$0xff] %vm16_vm3, %v1024_v7  ;;  %v993_v16 = vadd.f32 %v818_v12, %v108_v4  ;;  %v1025_v17 = vadd.f32 %v946_v13, %v140_v5  ;;  %v820_v18 = vpop.f32.mrb[55].mxu0  ;;  %v948_v19 = vpop.f32.mrb[55].mxu1 }
 0x168   :  { %v1713_v15 = vpack.c.bf16 %v1154_v11, %v1154_v11 }
 0x169   :  { %1443 = vst.msk [vmem:[%s2576_s2 + $0x60] sm:$0xf] %vm1418_vm4, %v1681_v14 }
 0x16a   :  { %v1123_v20 = vld [vmem:[#allocation2 + $0xc8] sm:$0xff]  ;;  %1475 = vst.msk [vmem:[%s2576_s2 + $0xe0] sm:$0xf] %vm1418_vm4, %v1713_v15 }
 0x16b   :  { %v1155_v21 = vld [vmem:[#allocation2 + $0x1c8] sm:$0xff]  ;;  %v1682_v22 = vpack.c.bf16 %v1123_v20, %v1123_v20  ;;  %1058 = vst.msk [vmem:[#allocation2 + $0xd8] sm:$0xff] %vm16_vm3, %v993_v16  ;;  %1090 = vst.msk [vmem:[#allocation2 + $0x1d8] sm:$0xff] %vm16_vm3, %v1025_v17 }
 0x16c   :  { %v1714_v23 = vpack.c.bf16 %v1155_v21, %v1155_v21  ;;  %v823_v26 = vpop.f32.mrb[56].mxu0  ;;  %v951_v27 = vpop.f32.mrb[56].mxu1 }
 0x16d   :  { %1444 = vst.msk [vmem:[%s2576_s2 + $0x64] sm:$0xf] %vm1418_vm4, %v1682_v22  ;;  %v994_v30 = vadd.f32 %v823_v26, %v109_v24  ;;  %v1026_v31 = vadd.f32 %v951_v27, %v141_v25  ;;  %v825_v32 = vpop.f32.mrb[57].mxu0  ;;  %v953_v33 = vpop.f32.mrb[57].mxu1 }
 0x16e   :  { %1476 = vst.msk [vmem:[%s2576_s2 + $0xe4] sm:$0xf] %vm1418_vm4, %v1714_v23  ;;  %v1124_v34 = vld [vmem:[#allocation2 + $0xd0] sm:$0xff]  ;;  %v826_v36 = vpop.f32.mrb[58].mxu0  ;;  %v954_v37 = vpop.f32.mrb[58].mxu1 }
 0x16f   :  { %v1156_v35 = vld [vmem:[#allocation2 + $0x1d0] sm:$0xff]  ;;  %v1683_v38 = vpack.c.bf16 %v1124_v34, %v1124_v34  ;;  %1059 = vst.msk [vmem:[#allocation2 + $0xe0] sm:$0xff] %vm16_vm3, %v994_v30  ;;  %1091 = vst.msk [vmem:[#allocation2 + $0x1e0] sm:$0xff] %vm16_vm3, %v1026_v31  ;;  %v995_v40 = vadd.f32 %v826_v36, %v110_v28  ;;  %v1027_v41 = vadd.f32 %v954_v37, %v142_v29  ;;  %v828_v42 = vpop.f32.mrb[59].mxu0  ;;  %v956_v43 = vpop.f32.mrb[59].mxu1 }
 0x170   :  { %v1715_v39 = vpack.c.bf16 %v1156_v35, %v1156_v35 }
 0x171   :  { %1445 = vst.msk [vmem:[%s2576_s2 + $0x68] sm:$0xf] %vm1418_vm4, %v1683_v38 }
 0x172   :  { %v1125_v44 = vld [vmem:[#allocation2 + $0xd8] sm:$0xff]  ;;  %1477 = vst.msk [vmem:[%s2576_s2 + $0xe8] sm:$0xf] %vm1418_vm4, %v1715_v39 }
 0x173   :  { %v1157_v45 = vld [vmem:[#allocation2 + $0x1d8] sm:$0xff]  ;;  %v1684_v46 = vpack.c.bf16 %v1125_v44, %v1125_v44  ;;  %1060 = vst.msk [vmem:[#allocation2 + $0xe8] sm:$0xff] %vm16_vm3, %v995_v40  ;;  %1092 = vst.msk [vmem:[#allocation2 + $0x1e8] sm:$0xff] %vm16_vm3, %v1027_v41 }
 0x174   :  { %v1716_v47 = vpack.c.bf16 %v1157_v45, %v1157_v45  ;;  %v831_v50 = vpop.f32.mrb[60].mxu0  ;;  %v959_v51 = vpop.f32.mrb[60].mxu1 }
 0x175   :  { %1446 = vst.msk [vmem:[%s2576_s2 + $0x6c] sm:$0xf] %vm1418_vm4, %v1684_v46  ;;  %v996_v54 = vadd.f32 %v831_v50, %v111_v48  ;;  %v1028_v55 = vadd.f32 %v959_v51, %v143_v49  ;;  %v833_v56 = vpop.f32.mrb[61].mxu0  ;;  %v961_v57 = vpop.f32.mrb[61].mxu1 }
 0x176   :  { %1478 = vst.msk [vmem:[%s2576_s2 + $0xec] sm:$0xf] %vm1418_vm4, %v1716_v47  ;;  %v1126_v58 = vld [vmem:[#allocation2 + $0xe0] sm:$0xff]  ;;  %v834_v60 = vpop.f32.mrb[62].mxu0  ;;  %v962_v61 = vpop.f32.mrb[62].mxu1 }
 0x177   :  { %v1158_v59 = vld [vmem:[#allocation2 + $0x1e0] sm:$0xff]  ;;  %v1685_v62 = vpack.c.bf16 %v1126_v58, %v1126_v58  ;;  %1061 = vst.msk [vmem:[#allocation2 + $0xf0] sm:$0xff] %vm16_vm3, %v996_v54  ;;  %1093 = vst.msk [vmem:[#allocation2 + $0x1f0] sm:$0xff] %vm16_vm3, %v1028_v55  ;;  %v997_v0 = vadd.f32 %v834_v60, %v112_v52  ;;  %v1029_v1 = vadd.f32 %v962_v61, %v144_v53  ;;  %v836_v2 = vpop.f32.mrb[63].mxu0  ;;  %v964_v3 = vpop.f32.mrb[63].mxu1 }
 0x178   :  { %v1717_v63 = vpack.c.bf16 %v1158_v59, %v1158_v59 }
 0x179   :  { %1447 = vst.msk [vmem:[%s2576_s2 + $0x70] sm:$0xf] %vm1418_vm4, %v1685_v62 }
 0x17a   :  { %v1127_v4 = vld [vmem:[#allocation2 + $0xe8] sm:$0xff]  ;;  %1479 = vst.msk [vmem:[%s2576_s2 + $0xf0] sm:$0xf] %vm1418_vm4, %v1717_v63 }
 0x17b   :  { %v1159_v5 = vld [vmem:[#allocation2 + $0x1e8] sm:$0xff]  ;;  %v1686_v6 = vpack.c.bf16 %v1127_v4, %v1127_v4  ;;  %1062 = vst.msk [vmem:[#allocation2 + $0xf8] sm:$0xff] %vm16_vm3, %v997_v0  ;;  %1094 = vst.msk [vmem:[#allocation2 + $0x1f8] sm:$0xff] %vm16_vm3, %v1029_v1 }
 0x17c   :  { %v1718_v7 = vpack.c.bf16 %v1159_v5, %v1159_v5 }
 0x17d   :  { %1448 = vst.msk [vmem:[%s2576_s2 + $0x74] sm:$0xf] %vm1418_vm4, %v1686_v6 }
 0x17e   :  { %1480 = vst.msk [vmem:[%s2576_s2 + $0xf4] sm:$0xf] %vm1418_vm4, %v1718_v7  ;;  %v1128_v8 = vld [vmem:[#allocation2 + $0xf0] sm:$0xff] }
 0x17f   :  { %v1160_v9 = vld [vmem:[#allocation2 + $0x1f0] sm:$0xff]  ;;  %v1687_v10 = vpack.c.bf16 %v1128_v8, %v1128_v8 }
 0x180   :  { %v1719_v11 = vpack.c.bf16 %v1160_v9, %v1160_v9 }
 0x181   :  { %1449 = vst.msk [vmem:[%s2576_s2 + $0x78] sm:$0xf] %vm1418_vm4, %v1687_v10 }
 0x182   :  { %v1129_v12 = vld [vmem:[#allocation2 + $0xf8] sm:$0xff]  ;;  %1481 = vst.msk [vmem:[%s2576_s2 + $0xf8] sm:$0xf] %vm1418_vm4, %v1719_v11 }
 0x183   :  { %v1161_v13 = vld [vmem:[#allocation2 + $0x1f8] sm:$0xff]  ;;  %v1688_v14 = vpack.c.bf16 %v1129_v12, %v1129_v12 }
 0x184   :  { %v1720_v15 = vpack.c.bf16 %v1161_v13, %v1161_v13 }
 0x185   :  { %1450 = vst.msk [vmem:[%s2576_s2 + $0x7c] sm:$0xf] %vm1418_vm4, %v1688_v14 }
 0x186   :  { %1482 = vst.msk [vmem:[%s2576_s2 + $0xfc] sm:$0xf] %vm1418_vm4, %v1720_v15 }

</bundles_post_ra>
